<compile_context>
chip_gen: v6e
topology: v6e:2x2x1
jax: 0.10.0
libtpu: 0.0.40
codegen_flags: <defaults>
</compile_context>

<pallas_src>
import functools

import jax
import jax.numpy as jnp
from jax import lax
from jax.experimental import pallas as pl
from jax.experimental.pallas import tpu as pltpu


def _rcab_kernel(x_ref, wf1_ref, b1_ref, wf2_ref, b2_ref,
                 wd_ref, bd_ref, wu_ref, bu_ref, out_ref, *, H, W, C):
    """One batch element in lane-packed layout: (H, W*C) -> (H, W*C)."""
    WC = W * C
    x = x_ref[...]                                        # (H, WC) f32

    row = lax.broadcasted_iota(jnp.int32, (H, WC), 0)
    lane = lax.broadcasted_iota(jnp.int32, (H, WC), 1)

    def im2col(act):
        """9-tap im2col of a lane-packed activation -> (H, 9*W*C) bf16.

        dy shifts are sublane rolls, dx shifts are lane rolls by C lanes;
        wrapped border entries are masked to zero ("same" padding)."""
        taps = []
        for dy in (-1, 0, 1):
            shifted = act if dy == 0 else pltpu.roll(act, shift=(-dy) % H, axis=0)
            for dx in (-1, 0, 1):
                p = shifted if dx == 0 else pltpu.roll(
                    shifted, shift=(-dx * C) % WC, axis=1)
                valid = None
                if dy == -1:
                    valid = row >= 1
                elif dy == 1:
                    valid = row <= H - 2
                if dx == -1:
                    m = lane >= C
                    valid = m if valid is None else valid & m
                elif dx == 1:
                    m = lane < (W - 1) * C
                    valid = m if valid is None else valid & m
                if valid is not None:
                    p = jnp.where(valid, p, 0.0)
                taps.append(p)
        return jnp.concatenate(taps, axis=1).astype(jnp.bfloat16)

    # ---- conv1 (3x3, same) as ONE matmul vs fused block-diag weight; ReLU ----
    acc1 = jnp.dot(im2col(x), wf1_ref[...], preferred_element_type=jnp.float32)
    act1 = jnp.maximum(acc1 + b1_ref[...], 0.0)           # (H, WC) f32

    # ---- conv2 (3x3, same) ----
    y = jnp.dot(im2col(act1), wf2_ref[...], preferred_element_type=jnp.float32)
    y = y + b2_ref[...]                                   # (H, WC) f32

    # ---- channel attention: GAP (folded into wd) -> ReLU -> FC -> sigmoid ----
    ysum = jnp.sum(y, axis=0, keepdims=True)              # (1, WC)
    hidden = jnp.maximum(
        jnp.dot(ysum, wd_ref[...], preferred_element_type=jnp.float32)
        + bd_ref[...], 0.0)                               # (1, C//r)
    att = jax.nn.sigmoid(
        jnp.dot(hidden, wu_ref[...], preferred_element_type=jnp.float32)
        + bu_ref[...])                                    # (1, WC) lane-layout gate

    # ---- scale + residual add (single full-width lane-dense store) ----
    out_ref[...] = y * att + x


def _fuse_conv_weight(w_hwio, W):
    """(3,3,C,C) HWIO -> (9*W*C, W*C) bf16 block-diagonal fused weight.

    Block (w, w) of tap (ky, kx) is w_hwio[ky, kx]; taps are stacked along
    the contraction axis in (ky, kx) row-major order (matches im2col)."""
    eye_w = jnp.eye(W, dtype=jnp.float32)
    blocks = [jnp.kron(eye_w, w_hwio[ky, kx].astype(jnp.float32))
              for ky in range(3) for kx in range(3)]
    return jnp.concatenate(blocks, axis=0).astype(jnp.bfloat16)


def rcab_forward(x_nchw, params):
    """Residual channel attention block. x_nchw: (N, C, H, W) float32."""
    N, C, H, W = x_nchw.shape
    Cr = params["wd"].shape[1]
    WC = W * C

    # layout glue: NCHW -> lane-packed (N, H, W*C), f32, no padding.
    x_lanes = jnp.transpose(x_nchw, (0, 2, 3, 1)).astype(jnp.float32)
    x_lanes = x_lanes.reshape(N, H, WC)

    # fuse / expand weights for the lane-packed layout (once, in XLA).
    wf1 = _fuse_conv_weight(params["w1"], W)                        # (9*WC, WC) bf16
    wf2 = _fuse_conv_weight(params["w2"], W)                        # (9*WC, WC) bf16
    b1_lane = jnp.tile(params["b1"].astype(jnp.float32), (1, W))    # (1, WC)
    b2_lane = jnp.tile(params["b2"].astype(jnp.float32), (1, W))    # (1, WC)
    eye_c = jnp.eye(C, dtype=jnp.float32)
    # GAP reducer + 1/(H*W) folded into the downscale FC weight.
    wd_fused = (jnp.tile(eye_c, (W, 1)) @ params["wd"]) / float(H * W)  # (WC, Cr)
    bd = params["bd"].astype(jnp.float32)                           # (1, Cr)
    # upscale FC expanded so the sigmoid gate lands directly in lane layout.
    wu_fused = params["wu"] @ jnp.tile(eye_c, (1, W))               # (Cr, WC)
    bu_lane = jnp.tile(params["bu"].astype(jnp.float32), (1, W))    # (1, WC)

    kernel = functools.partial(_rcab_kernel, H=H, W=W, C=C)

    out = pl.pallas_call(
        kernel,
        out_shape=jax.ShapeDtypeStruct((N, H, WC), jnp.float32),
        grid_spec=pltpu.PrefetchScalarGridSpec(
            num_scalar_prefetch=0,
            grid=(N,),
            in_specs=[
                pl.BlockSpec((pl.Squeezed(), H, WC), lambda n: (n, 0, 0)),
                pl.BlockSpec((9 * WC, WC), lambda n: (0, 0)),
                pl.BlockSpec((1, WC), lambda n: (0, 0)),
                pl.BlockSpec((9 * WC, WC), lambda n: (0, 0)),
                pl.BlockSpec((1, WC), lambda n: (0, 0)),
                pl.BlockSpec((WC, Cr), lambda n: (0, 0)),
                pl.BlockSpec((1, Cr), lambda n: (0, 0)),
                pl.BlockSpec((Cr, WC), lambda n: (0, 0)),
                pl.BlockSpec((1, WC), lambda n: (0, 0)),
            ],
            out_specs=pl.BlockSpec((pl.Squeezed(), H, WC), lambda n: (n, 0, 0)),
        ),
        compiler_params=pltpu.CompilerParams(
            dimension_semantics=("parallel",)),
    )(x_lanes, wf1, b1_lane, wf2, b2_lane, wd_fused, bd, wu_fused, bu_lane)

    # (N, H, W*C) -> (N, C, H, W)
    return jnp.transpose(out.reshape(N, H, W, C), (0, 3, 1, 2))


def init_params(key, channel, reduction):
    """Deterministic synthetic parameters (shapes match nn.Module __init__)."""
    cr = channel // reduction
    ks = jax.random.split(key, 8)
    scale = 0.1
    return {
        # 3x3 convs, HWIO layout (PyTorch OIHW -> transpose(2,3,1,0))
        "w1": scale * jax.random.normal(ks[0], (3, 3, channel, channel), jnp.float32),
        "b1": scale * jax.random.normal(ks[1], (1, channel), jnp.float32),
        "w2": scale * jax.random.normal(ks[2], (3, 3, channel, channel), jnp.float32),
        "b2": scale * jax.random.normal(ks[3], (1, channel), jnp.float32),
        # 1x1 convs of the attention branch as dense mats (Cin, Cout)
        "wd": scale * jax.random.normal(ks[4], (channel, cr), jnp.float32),
        "bd": scale * jax.random.normal(ks[5], (1, cr), jnp.float32),
        "wu": scale * jax.random.normal(ks[6], (cr, channel), jnp.float32),
        "bu": scale * jax.random.normal(ks[7], (1, channel), jnp.float32),
    }


def rcab_reference(x_nchw, params):
    """Plain-JAX reference (mirrors the PyTorch forward; same bf16 matmul
    inputs / f32 accumulation as the kernel) for validation."""
    x = jnp.transpose(x_nchw, (0, 2, 3, 1)).astype(jnp.float32)  # NHWC
    dn = ("NHWC", "HWIO", "NHWC")
    w1 = params["w1"].astype(jnp.bfloat16)
    w2 = params["w2"].astype(jnp.bfloat16)
    y = lax.conv_general_dilated(x.astype(jnp.bfloat16), w1, (1, 1), "SAME",
                                 dimension_numbers=dn,
                                 preferred_element_type=jnp.float32)
    y = jnp.maximum(y + params["b1"][0], 0.0)
    y = lax.conv_general_dilated(y.astype(jnp.bfloat16), w2, (1, 1), "SAME",
                                 dimension_numbers=dn,
                                 preferred_element_type=jnp.float32)
    y = y + params["b2"][0]
    gap = jnp.mean(y, axis=(1, 2))                              # (N, C)
    h = jnp.maximum(gap @ params["wd"] + params["bd"][0], 0.0)  # (N, C//r)
    att = jax.nn.sigmoid(h @ params["wu"] + params["bu"][0])    # (N, C)
    out = y * att[:, None, None, :] + x
    return jnp.transpose(out, (0, 3, 1, 2))


if __name__ == "__main__":
    key = jax.random.PRNGKey(0)
    k_x, k_p = jax.random.split(key)

    N, C, H, W = 2, 8, 16, 16          # W*C = 128 -> fully lane-dense
    reduction = 4

    x = jax.random.normal(k_x, (N, C, H, W), jnp.float32)
    params = init_params(k_p, C, reduction)

    out = jax.jit(rcab_forward)(x, params)
    out = jax.block_until_ready(out)

    ref = rcab_reference(x, params)
    assert out.shape == (N, C, H, W)
    assert jnp.allclose(out, ref, atol=2e-3, rtol=2e-3), "mismatch vs reference"

    print("KERNEL_OK")
</pallas_src>

<mosaic_0001>
module attributes {stable_mosaic.version = 11 : i64} {
  func.func @_rcab_kernel(%arg0: i32, %arg1: memref<1x16x128xf32, #tpu.memory_space<vmem>>, %arg2: memref<1152x128xbf16, #tpu.memory_space<vmem>>, %arg3: memref<1x128xf32, #tpu.memory_space<vmem>>, %arg4: memref<1152x128xbf16, #tpu.memory_space<vmem>>, %arg5: memref<1x128xf32, #tpu.memory_space<vmem>>, %arg6: memref<128x2xf32, #tpu.memory_space<vmem>>, %arg7: memref<1x2xf32, #tpu.memory_space<vmem>>, %arg8: memref<2x128xf32, #tpu.memory_space<vmem>>, %arg9: memref<1x128xf32, #tpu.memory_space<vmem>>, %arg10: memref<1x16x128xf32, #tpu.memory_space<vmem>>) attributes {dimension_semantics = [#tpu.dimension_semantics<parallel>], iteration_bounds = array<i64: 2>, scalar_prefetch = 0 : i64, scratch_operands = 0 : i64, tpu.core_type = #tpu.core_type<tc>, window_params = [{transform_indices = @transform_0, window_bounds = array<i64: 1, 16, 128>}, {pipeline_mode = #tpu.pipeline_mode<synchronous>, transform_indices = @transform_1, window_bounds = array<i64: 1152, 128>}, {pipeline_mode = #tpu.pipeline_mode<synchronous>, transform_indices = @transform_2, window_bounds = array<i64: 1, 128>}, {pipeline_mode = #tpu.pipeline_mode<synchronous>, transform_indices = @transform_3, window_bounds = array<i64: 1152, 128>}, {pipeline_mode = #tpu.pipeline_mode<synchronous>, transform_indices = @transform_4, window_bounds = array<i64: 1, 128>}, {pipeline_mode = #tpu.pipeline_mode<synchronous>, transform_indices = @transform_5, window_bounds = array<i64: 128, 2>}, {pipeline_mode = #tpu.pipeline_mode<synchronous>, transform_indices = @transform_6, window_bounds = array<i64: 1, 2>}, {pipeline_mode = #tpu.pipeline_mode<synchronous>, transform_indices = @transform_7, window_bounds = array<i64: 2, 128>}, {pipeline_mode = #tpu.pipeline_mode<synchronous>, transform_indices = @transform_8, window_bounds = array<i64: 1, 128>}, {transform_indices = @transform_9, window_bounds = array<i64: 1, 16, 128>}]} {
    %c0 = arith.constant 0 : index
    %c0_0 = arith.constant 0 : index
    %c0_1 = arith.constant 0 : index
    %0 = vector.load %arg1[%c0, %c0_0, %c0_1] : memref<1x16x128xf32, #tpu.memory_space<vmem>>, vector<1x16x128xf32>
    %1 = vector.shape_cast %0 : vector<1x16x128xf32> to vector<16x128xf32>
    %2 = tpu.iota {dimensions = array<i32: 0>} : vector<16x128xi32>
    %3 = tpu.iota {dimensions = array<i32: 1>} : vector<16x128xi32>
    %c1_i32 = arith.constant 1 : i32
    %4 = tpu.dynamic_rotate %1 by %c1_i32 dim 0 : vector<16x128xf32>, i32 -> vector<16x128xf32>
    %c8_i32 = arith.constant 8 : i32
    %5 = tpu.dynamic_rotate %4 by %c8_i32 dim 1 : vector<16x128xf32>, i32 -> vector<16x128xf32>
    %c1_i32_2 = arith.constant 1 : i32
    %6 = vector.broadcast %c1_i32_2 : i32 to vector<16x128xi32>
    %7 = arith.cmpi sge, %2, %6 : vector<16x128xi32>
    %c8_i32_3 = arith.constant 8 : i32
    %8 = vector.broadcast %c8_i32_3 : i32 to vector<16x128xi32>
    %9 = arith.cmpi sge, %3, %8 : vector<16x128xi32>
    %10 = arith.andi %7, %9 : vector<16x128xi1>
    %cst = arith.constant 0.000000e+00 : f32
    %11 = vector.broadcast %cst : f32 to vector<16x128xf32>
    %12 = arith.select %10, %5, %11 : vector<16x128xi1>, vector<16x128xf32>
    %c1_i32_4 = arith.constant 1 : i32
    %13 = vector.broadcast %c1_i32_4 : i32 to vector<16x128xi32>
    %14 = arith.cmpi sge, %2, %13 : vector<16x128xi32>
    %cst_5 = arith.constant 0.000000e+00 : f32
    %15 = vector.broadcast %cst_5 : f32 to vector<16x128xf32>
    %16 = arith.select %14, %4, %15 : vector<16x128xi1>, vector<16x128xf32>
    %c120_i32 = arith.constant 120 : i32
    %17 = tpu.dynamic_rotate %4 by %c120_i32 dim 1 : vector<16x128xf32>, i32 -> vector<16x128xf32>
    %c1_i32_6 = arith.constant 1 : i32
    %18 = vector.broadcast %c1_i32_6 : i32 to vector<16x128xi32>
    %19 = arith.cmpi sge, %2, %18 : vector<16x128xi32>
    %c120_i32_7 = arith.constant 120 : i32
    %20 = vector.broadcast %c120_i32_7 : i32 to vector<16x128xi32>
    %21 = arith.cmpi slt, %3, %20 : vector<16x128xi32>
    %22 = arith.andi %19, %21 : vector<16x128xi1>
    %cst_8 = arith.constant 0.000000e+00 : f32
    %23 = vector.broadcast %cst_8 : f32 to vector<16x128xf32>
    %24 = arith.select %22, %17, %23 : vector<16x128xi1>, vector<16x128xf32>
    %c8_i32_9 = arith.constant 8 : i32
    %25 = tpu.dynamic_rotate %1 by %c8_i32_9 dim 1 : vector<16x128xf32>, i32 -> vector<16x128xf32>
    %c8_i32_10 = arith.constant 8 : i32
    %26 = vector.broadcast %c8_i32_10 : i32 to vector<16x128xi32>
    %27 = arith.cmpi sge, %3, %26 : vector<16x128xi32>
    %cst_11 = arith.constant 0.000000e+00 : f32
    %28 = vector.broadcast %cst_11 : f32 to vector<16x128xf32>
    %29 = arith.select %27, %25, %28 : vector<16x128xi1>, vector<16x128xf32>
    %c120_i32_12 = arith.constant 120 : i32
    %30 = tpu.dynamic_rotate %1 by %c120_i32_12 dim 1 : vector<16x128xf32>, i32 -> vector<16x128xf32>
    %c120_i32_13 = arith.constant 120 : i32
    %31 = vector.broadcast %c120_i32_13 : i32 to vector<16x128xi32>
    %32 = arith.cmpi slt, %3, %31 : vector<16x128xi32>
    %cst_14 = arith.constant 0.000000e+00 : f32
    %33 = vector.broadcast %cst_14 : f32 to vector<16x128xf32>
    %34 = arith.select %32, %30, %33 : vector<16x128xi1>, vector<16x128xf32>
    %c15_i32 = arith.constant 15 : i32
    %35 = tpu.dynamic_rotate %1 by %c15_i32 dim 0 : vector<16x128xf32>, i32 -> vector<16x128xf32>
    %c8_i32_15 = arith.constant 8 : i32
    %36 = tpu.dynamic_rotate %35 by %c8_i32_15 dim 1 : vector<16x128xf32>, i32 -> vector<16x128xf32>
    %c14_i32 = arith.constant 14 : i32
    %37 = vector.broadcast %c14_i32 : i32 to vector<16x128xi32>
    %38 = arith.cmpi sle, %2, %37 : vector<16x128xi32>
    %c8_i32_16 = arith.constant 8 : i32
    %39 = vector.broadcast %c8_i32_16 : i32 to vector<16x128xi32>
    %40 = arith.cmpi sge, %3, %39 : vector<16x128xi32>
    %41 = arith.andi %38, %40 : vector<16x128xi1>
    %cst_17 = arith.constant 0.000000e+00 : f32
    %42 = vector.broadcast %cst_17 : f32 to vector<16x128xf32>
    %43 = arith.select %41, %36, %42 : vector<16x128xi1>, vector<16x128xf32>
    %c14_i32_18 = arith.constant 14 : i32
    %44 = vector.broadcast %c14_i32_18 : i32 to vector<16x128xi32>
    %45 = arith.cmpi sle, %2, %44 : vector<16x128xi32>
    %cst_19 = arith.constant 0.000000e+00 : f32
    %46 = vector.broadcast %cst_19 : f32 to vector<16x128xf32>
    %47 = arith.select %45, %35, %46 : vector<16x128xi1>, vector<16x128xf32>
    %c120_i32_20 = arith.constant 120 : i32
    %48 = tpu.dynamic_rotate %35 by %c120_i32_20 dim 1 : vector<16x128xf32>, i32 -> vector<16x128xf32>
    %c14_i32_21 = arith.constant 14 : i32
    %49 = vector.broadcast %c14_i32_21 : i32 to vector<16x128xi32>
    %50 = arith.cmpi sle, %2, %49 : vector<16x128xi32>
    %c120_i32_22 = arith.constant 120 : i32
    %51 = vector.broadcast %c120_i32_22 : i32 to vector<16x128xi32>
    %52 = arith.cmpi slt, %3, %51 : vector<16x128xi32>
    %53 = arith.andi %50, %52 : vector<16x128xi1>
    %cst_23 = arith.constant 0.000000e+00 : f32
    %54 = vector.broadcast %cst_23 : f32 to vector<16x128xf32>
    %55 = arith.select %53, %48, %54 : vector<16x128xi1>, vector<16x128xf32>
    %56 = tpu.concatenate %12, %16, %24, %29, %1, %34, %43, %47, %55 in 1 : vector<16x128xf32>, vector<16x128xf32>, vector<16x128xf32>, vector<16x128xf32>, vector<16x128xf32>, vector<16x128xf32>, vector<16x128xf32>, vector<16x128xf32>, vector<16x128xf32> -> vector<16x1152xf32>
    %57 = arith.truncf %56 : vector<16x1152xf32> to vector<16x1152xbf16>
    %c0_24 = arith.constant 0 : index
    %c0_25 = arith.constant 0 : index
    %58 = vector.load %arg2[%c0_24, %c0_25] : memref<1152x128xbf16, #tpu.memory_space<vmem>>, vector<1152x128xbf16>
    %cst_26 = arith.constant dense<0.000000e+00> : vector<16x128xf32>
    %59 = tpu.matmul %57, %58, %cst_26 {dimension_numbers = #tpu.dot_dimension_numbers<[1], [0], [0], [1], [0, 0, 1, 1], [], []>} : vector<16x1152xbf16>, vector<1152x128xbf16>, vector<16x128xf32> -> vector<16x128xf32>
    %c0_27 = arith.constant 0 : index
    %c0_28 = arith.constant 0 : index
    %60 = vector.load %arg3[%c0_27, %c0_28] : memref<1x128xf32, #tpu.memory_space<vmem>>, vector<1x128xf32>
    %61 = vector.broadcast %60 : vector<1x128xf32> to vector<16x128xf32>
    %62 = arith.addf %59, %61 : vector<16x128xf32>
    %cst_29 = arith.constant 0.000000e+00 : f32
    %63 = vector.broadcast %cst_29 : f32 to vector<16x128xf32>
    %64 = arith.maximumf %62, %63 : vector<16x128xf32>
    %c1_i32_30 = arith.constant 1 : i32
    %65 = tpu.dynamic_rotate %64 by %c1_i32_30 dim 0 : vector<16x128xf32>, i32 -> vector<16x128xf32>
    %c8_i32_31 = arith.constant 8 : i32
    %66 = tpu.dynamic_rotate %65 by %c8_i32_31 dim 1 : vector<16x128xf32>, i32 -> vector<16x128xf32>
    %c1_i32_32 = arith.constant 1 : i32
    %67 = vector.broadcast %c1_i32_32 : i32 to vector<16x128xi32>
    %68 = arith.cmpi sge, %2, %67 : vector<16x128xi32>
    %c8_i32_33 = arith.constant 8 : i32
    %69 = vector.broadcast %c8_i32_33 : i32 to vector<16x128xi32>
    %70 = arith.cmpi sge, %3, %69 : vector<16x128xi32>
    %71 = arith.andi %68, %70 : vector<16x128xi1>
    %cst_34 = arith.constant 0.000000e+00 : f32
    %72 = vector.broadcast %cst_34 : f32 to vector<16x128xf32>
    %73 = arith.select %71, %66, %72 : vector<16x128xi1>, vector<16x128xf32>
    %c1_i32_35 = arith.constant 1 : i32
    %74 = vector.broadcast %c1_i32_35 : i32 to vector<16x128xi32>
    %75 = arith.cmpi sge, %2, %74 : vector<16x128xi32>
    %cst_36 = arith.constant 0.000000e+00 : f32
    %76 = vector.broadcast %cst_36 : f32 to vector<16x128xf32>
    %77 = arith.select %75, %65, %76 : vector<16x128xi1>, vector<16x128xf32>
    %c120_i32_37 = arith.constant 120 : i32
    %78 = tpu.dynamic_rotate %65 by %c120_i32_37 dim 1 : vector<16x128xf32>, i32 -> vector<16x128xf32>
    %c1_i32_38 = arith.constant 1 : i32
    %79 = vector.broadcast %c1_i32_38 : i32 to vector<16x128xi32>
    %80 = arith.cmpi sge, %2, %79 : vector<16x128xi32>
    %c120_i32_39 = arith.constant 120 : i32
    %81 = vector.broadcast %c120_i32_39 : i32 to vector<16x128xi32>
    %82 = arith.cmpi slt, %3, %81 : vector<16x128xi32>
    %83 = arith.andi %80, %82 : vector<16x128xi1>
    %cst_40 = arith.constant 0.000000e+00 : f32
    %84 = vector.broadcast %cst_40 : f32 to vector<16x128xf32>
    %85 = arith.select %83, %78, %84 : vector<16x128xi1>, vector<16x128xf32>
    %c8_i32_41 = arith.constant 8 : i32
    %86 = tpu.dynamic_rotate %64 by %c8_i32_41 dim 1 : vector<16x128xf32>, i32 -> vector<16x128xf32>
    %c8_i32_42 = arith.constant 8 : i32
    %87 = vector.broadcast %c8_i32_42 : i32 to vector<16x128xi32>
    %88 = arith.cmpi sge, %3, %87 : vector<16x128xi32>
    %cst_43 = arith.constant 0.000000e+00 : f32
    %89 = vector.broadcast %cst_43 : f32 to vector<16x128xf32>
    %90 = arith.select %88, %86, %89 : vector<16x128xi1>, vector<16x128xf32>
    %c120_i32_44 = arith.constant 120 : i32
    %91 = tpu.dynamic_rotate %64 by %c120_i32_44 dim 1 : vector<16x128xf32>, i32 -> vector<16x128xf32>
    %c120_i32_45 = arith.constant 120 : i32
    %92 = vector.broadcast %c120_i32_45 : i32 to vector<16x128xi32>
    %93 = arith.cmpi slt, %3, %92 : vector<16x128xi32>
    %cst_46 = arith.constant 0.000000e+00 : f32
    %94 = vector.broadcast %cst_46 : f32 to vector<16x128xf32>
    %95 = arith.select %93, %91, %94 : vector<16x128xi1>, vector<16x128xf32>
    %c15_i32_47 = arith.constant 15 : i32
    %96 = tpu.dynamic_rotate %64 by %c15_i32_47 dim 0 : vector<16x128xf32>, i32 -> vector<16x128xf32>
    %c8_i32_48 = arith.constant 8 : i32
    %97 = tpu.dynamic_rotate %96 by %c8_i32_48 dim 1 : vector<16x128xf32>, i32 -> vector<16x128xf32>
    %c14_i32_49 = arith.constant 14 : i32
    %98 = vector.broadcast %c14_i32_49 : i32 to vector<16x128xi32>
    %99 = arith.cmpi sle, %2, %98 : vector<16x128xi32>
    %c8_i32_50 = arith.constant 8 : i32
    %100 = vector.broadcast %c8_i32_50 : i32 to vector<16x128xi32>
    %101 = arith.cmpi sge, %3, %100 : vector<16x128xi32>
    %102 = arith.andi %99, %101 : vector<16x128xi1>
    %cst_51 = arith.constant 0.000000e+00 : f32
    %103 = vector.broadcast %cst_51 : f32 to vector<16x128xf32>
    %104 = arith.select %102, %97, %103 : vector<16x128xi1>, vector<16x128xf32>
    %c14_i32_52 = arith.constant 14 : i32
    %105 = vector.broadcast %c14_i32_52 : i32 to vector<16x128xi32>
    %106 = arith.cmpi sle, %2, %105 : vector<16x128xi32>
    %cst_53 = arith.constant 0.000000e+00 : f32
    %107 = vector.broadcast %cst_53 : f32 to vector<16x128xf32>
    %108 = arith.select %106, %96, %107 : vector<16x128xi1>, vector<16x128xf32>
    %c120_i32_54 = arith.constant 120 : i32
    %109 = tpu.dynamic_rotate %96 by %c120_i32_54 dim 1 : vector<16x128xf32>, i32 -> vector<16x128xf32>
    %c14_i32_55 = arith.constant 14 : i32
    %110 = vector.broadcast %c14_i32_55 : i32 to vector<16x128xi32>
    %111 = arith.cmpi sle, %2, %110 : vector<16x128xi32>
    %c120_i32_56 = arith.constant 120 : i32
    %112 = vector.broadcast %c120_i32_56 : i32 to vector<16x128xi32>
    %113 = arith.cmpi slt, %3, %112 : vector<16x128xi32>
    %114 = arith.andi %111, %113 : vector<16x128xi1>
    %cst_57 = arith.constant 0.000000e+00 : f32
    %115 = vector.broadcast %cst_57 : f32 to vector<16x128xf32>
    %116 = arith.select %114, %109, %115 : vector<16x128xi1>, vector<16x128xf32>
    %117 = tpu.concatenate %73, %77, %85, %90, %64, %95, %104, %108, %116 in 1 : vector<16x128xf32>, vector<16x128xf32>, vector<16x128xf32>, vector<16x128xf32>, vector<16x128xf32>, vector<16x128xf32>, vector<16x128xf32>, vector<16x128xf32>, vector<16x128xf32> -> vector<16x1152xf32>
    %118 = arith.truncf %117 : vector<16x1152xf32> to vector<16x1152xbf16>
    %c0_58 = arith.constant 0 : index
    %c0_59 = arith.constant 0 : index
    %119 = vector.load %arg4[%c0_58, %c0_59] : memref<1152x128xbf16, #tpu.memory_space<vmem>>, vector<1152x128xbf16>
    %cst_60 = arith.constant dense<0.000000e+00> : vector<16x128xf32>
    %120 = tpu.matmul %118, %119, %cst_60 {dimension_numbers = #tpu.dot_dimension_numbers<[1], [0], [0], [1], [0, 0, 1, 1], [], []>} : vector<16x1152xbf16>, vector<1152x128xbf16>, vector<16x128xf32> -> vector<16x128xf32>
    %c0_61 = arith.constant 0 : index
    %c0_62 = arith.constant 0 : index
    %121 = vector.load %arg5[%c0_61, %c0_62] : memref<1x128xf32, #tpu.memory_space<vmem>>, vector<1x128xf32>
    %122 = vector.broadcast %121 : vector<1x128xf32> to vector<16x128xf32>
    %123 = arith.addf %120, %122 : vector<16x128xf32>
    %cst_63 = arith.constant dense<0.000000e+00> : vector<128xf32>
    %124 = vector.multi_reduction <add>, %123, %cst_63 [0] : vector<16x128xf32> to vector<128xf32>
    %125 = vector.shape_cast %124 : vector<128xf32> to vector<1x128xf32>
    %c0_64 = arith.constant 0 : index
    %c0_65 = arith.constant 0 : index
    %126 = vector.load %arg6[%c0_64, %c0_65] : memref<128x2xf32, #tpu.memory_space<vmem>>, vector<128x2xf32>
    %cst_66 = arith.constant dense<0.000000e+00> : vector<1x2xf32>
    %127 = tpu.matmul %125, %126, %cst_66 {dimension_numbers = #tpu.dot_dimension_numbers<[1], [0], [0], [1], [0, 0, 1, 1], [], []>} : vector<1x128xf32>, vector<128x2xf32>, vector<1x2xf32> -> vector<1x2xf32>
    %c0_67 = arith.constant 0 : index
    %c0_68 = arith.constant 0 : index
    %128 = vector.load %arg7[%c0_67, %c0_68] : memref<1x2xf32, #tpu.memory_space<vmem>>, vector<1x2xf32>
    %129 = arith.addf %127, %128 : vector<1x2xf32>
    %cst_69 = arith.constant 0.000000e+00 : f32
    %130 = vector.broadcast %cst_69 : f32 to vector<1x2xf32>
    %131 = arith.maximumf %129, %130 : vector<1x2xf32>
    %c0_70 = arith.constant 0 : index
    %c0_71 = arith.constant 0 : index
    %132 = vector.load %arg8[%c0_70, %c0_71] : memref<2x128xf32, #tpu.memory_space<vmem>>, vector<2x128xf32>
    %cst_72 = arith.constant dense<0.000000e+00> : vector<1x128xf32>
    %133 = tpu.matmul %131, %132, %cst_72 {dimension_numbers = #tpu.dot_dimension_numbers<[1], [0], [0], [1], [0, 0, 1, 1], [], []>} : vector<1x2xf32>, vector<2x128xf32>, vector<1x128xf32> -> vector<1x128xf32>
    %c0_73 = arith.constant 0 : index
    %c0_74 = arith.constant 0 : index
    %134 = vector.load %arg9[%c0_73, %c0_74] : memref<1x128xf32, #tpu.memory_space<vmem>>, vector<1x128xf32>
    %135 = arith.addf %133, %134 : vector<1x128xf32>
    %136 = arith.negf %135 : vector<1x128xf32>
    %137 = math.exp %136 : vector<1x128xf32>
    %cst_75 = arith.constant 1.000000e+00 : f32
    %138 = vector.broadcast %cst_75 : f32 to vector<1x128xf32>
    %139 = arith.addf %138, %137 : vector<1x128xf32>
    %140 = arith.divf %138, %139 : vector<1x128xf32>
    %141 = vector.broadcast %140 : vector<1x128xf32> to vector<16x128xf32>
    %142 = arith.mulf %123, %141 : vector<16x128xf32>
    %143 = arith.addf %142, %1 : vector<16x128xf32>
    %c0_76 = arith.constant 0 : index
    %c0_77 = arith.constant 0 : index
    %c0_78 = arith.constant 0 : index
    %144 = vector.load %arg10[%c0_76, %c0_77, %c0_78] : memref<1x16x128xf32, #tpu.memory_space<vmem>>, vector<1x16x128xf32>
    %145 = vector.shape_cast %144 : vector<1x16x128xf32> to vector<16x128xf32>
    %146 = vector.shape_cast %143 : vector<16x128xf32> to vector<1x16x128xf32>
    tpu.vector_store %arg10[%c0_76, %c0_77, %c0_78], %146 {strides = array<i32>} : memref<1x16x128xf32, #tpu.memory_space<vmem>>, vector<1x16x128xf32>,
    return
  }
  func.func @transform_0(%arg0: i32) -> (i32, i32, i32) {
    %c0_i32 = arith.constant 0 : i32
    %c0_i32_0 = arith.constant 0 : i32
    %c0_i32_1 = arith.constant 0 : i32
    return %arg0, %c0_i32, %c0_i32_0 : i32, i32, i32
  }
  func.func @transform_1(%arg0: i32) -> (i32, i32) {
    %c0_i32 = arith.constant 0 : i32
    %c0_i32_0 = arith.constant 0 : i32
    %c0_i32_1 = arith.constant 0 : i32
    return %c0_i32, %c0_i32_0 : i32, i32
  }
  func.func @transform_2(%arg0: i32) -> (i32, i32) {
    %c0_i32 = arith.constant 0 : i32
    %c0_i32_0 = arith.constant 0 : i32
    %c0_i32_1 = arith.constant 0 : i32
    return %c0_i32, %c0_i32_0 : i32, i32
  }
  func.func @transform_3(%arg0: i32) -> (i32, i32) {
    %c0_i32 = arith.constant 0 : i32
    %c0_i32_0 = arith.constant 0 : i32
    %c0_i32_1 = arith.constant 0 : i32
    return %c0_i32, %c0_i32_0 : i32, i32
  }
  func.func @transform_4(%arg0: i32) -> (i32, i32) {
    %c0_i32 = arith.constant 0 : i32
    %c0_i32_0 = arith.constant 0 : i32
    %c0_i32_1 = arith.constant 0 : i32
    return %c0_i32, %c0_i32_0 : i32, i32
  }
  func.func @transform_5(%arg0: i32) -> (i32, i32) {
    %c0_i32 = arith.constant 0 : i32
    %c0_i32_0 = arith.constant 0 : i32
    %c0_i32_1 = arith.constant 0 : i32
    return %c0_i32, %c0_i32_0 : i32, i32
  }
  func.func @transform_6(%arg0: i32) -> (i32, i32) {
    %c0_i32 = arith.constant 0 : i32
    %c0_i32_0 = arith.constant 0 : i32
    %c0_i32_1 = arith.constant 0 : i32
    return %c0_i32, %c0_i32_0 : i32, i32
  }
  func.func @transform_7(%arg0: i32) -> (i32, i32) {
    %c0_i32 = arith.constant 0 : i32
    %c0_i32_0 = arith.constant 0 : i32
    %c0_i32_1 = arith.constant 0 : i32
    return %c0_i32, %c0_i32_0 : i32, i32
  }
  func.func @transform_8(%arg0: i32) -> (i32, i32) {
    %c0_i32 = arith.constant 0 : i32
    %c0_i32_0 = arith.constant 0 : i32
    %c0_i32_1 = arith.constant 0 : i32
    return %c0_i32, %c0_i32_0 : i32, i32
  }
  func.func @transform_9(%arg0: i32) -> (i32, i32, i32) {
    %c0_i32 = arith.constant 0 : i32
    %c0_i32_0 = arith.constant 0 : i32
    %c0_i32_1 = arith.constant 0 : i32
    return %arg0, %c0_i32, %c0_i32_0 : i32, i32, i32
  }
}

</mosaic_0001>

<bundles_post_ra>
// kernel: tile.44
= control target key start
LH: loop header
LB: loop body
LE: loop exit
PB: predicated region body
PF: predicated region fallthrough
CT: control target
= control target key end

     0   :  { %s742_s18 = smov 3  ;;  %s744_s19 = smov 12  ;;  %vm262_vm0 = vcmask 1043458   ;;  %vm266_vm1 = vcmask 1045508   ;;  %vm270_vm2 = vcmask 1047558   ;;  %vm272_vm3 = vcmask 64512   ;;  %s832_s0 = inlined_call_operand.vmem [shape: bf16[8,16,8], index: 0, kind: input, shape index: {}]   ;;  %s833_s1 = inlined_call_operand.vmem [shape: bf16[8,128], index: 1, kind: output, shape index: {}]  }
   0x1   :  { %v675_v0 = vld [vmem:[%s832_s0 + $0x38] sm:$0xff]   ;;  %v676_v1 = vld [vmem:[%s832_s0 + $0x30] sm:$0xff]   ;;  %v677_v2 = vld [vmem:[%s832_s0 + $0x28] sm:$0xff]   ;;  %s754_s24 = smov 192  ;;  %s756_s25 = smov 3  ;;  %vm294_vm4 = vcmask 1048512  }
   0x2   :  { %v646_v3 = vunpack.c.h.bf16 %v675_v0  ;;  %v650_v4 = vunpack.c.h.bf16 %v676_v1  ;;  %v654_v5 = vunpack.c.h.bf16 %v677_v2  ;;  %v678_v6 = vld [vmem:[%s832_s0 + $0x20] sm:$0xff]   ;;  %v679_v7 = vld [vmem:[%s832_s0 + $0x18] sm:$0xff]   ;;  %v680_v8 = vld [vmem:[%s832_s0 + $0x10] sm:$0xff]   ;;  %v645_v9 = vunpack.c.l.bf16 %v675_v0  ;;  %s758_s26 = smov 12  ;;  %s760_s27 = smov 48 }
   0x3   :  { %v658_v10 = vunpack.c.h.bf16 %v678_v6  ;;  %v662_v11 = vunpack.c.h.bf16 %v679_v7  ;;  %v666_v12 = vunpack.c.h.bf16 %v680_v8  ;;  %v681_v13 = vld [vmem:[%s832_s0 + $0x8] sm:$0xff]   ;;  %v672_v14 = vld [vmem:[%s832_s0] sm:$0xff]   ;;  %s752_s0 = smov 48  ;;  %v649_v15 = vunpack.c.l.bf16 %v676_v1  ;;  %s762_s28 = smov 192 }
   0x4   :  { %21 = vst [vmem:[#allocation1 + $0x78] sm:$0xff] %v646_v3  ;;  %53 = vst [vmem:[#allocation1 + $0x68] sm:$0xff] %v650_v4  ;;  %v670_v16 = vunpack.c.h.bf16 %v681_v13  ;;  %v674_v17 = vunpack.c.h.bf16 %v672_v14  ;;  %v653_v18 = vunpack.c.l.bf16 %v677_v2  ;;  %v657_v19 = vunpack.c.l.bf16 %v678_v6  ;;  %s297_s29 = smov 3  ;;  %s300_s30 = smov 12 }
   0x5   :  { %85 = vst [vmem:[#allocation1 + $0x58] sm:$0xff] %v654_v5  ;;  %37 = vst [vmem:[#allocation1 + $0x70] sm:$0xff] %v645_v9  ;;  %v661_v20 = vunpack.c.l.bf16 %v679_v7  ;;  %v665_v21 = vunpack.c.l.bf16 %v680_v8  ;;  %v669_v22 = vunpack.c.l.bf16 %v681_v13  ;;  %v673_v23 = vunpack.c.l.bf16 %v672_v14  ;;  %s305_s2 = smov 48  ;;  %s310_s3 = smov 192 }
   0x6   :  { %117 = vst [vmem:[#allocation1 + $0x48] sm:$0xff] %v658_v10  ;;  %149 = vst [vmem:[#allocation1 + $0x38] sm:$0xff] %v662_v11  ;;  %s341_s4 = smov 3  ;;  %s344_s5 = smov 12  ;;  %vm316_vm5 = vcmask 982912   ;;  %vm338_vm6 = vcmask 917312  }
   0x7   :  { %181 = vst [vmem:[#allocation1 + $0x28] sm:$0xff] %v666_v12  ;;  %69 = vst [vmem:[#allocation1 + $0x60] sm:$0xff] %v649_v15  ;;  %s349_s6 = smov 48  ;;  %s764_s7 = smov 192  ;;  %vm360_vm7 = vcmask 851712   ;;  %vm382_vm8 = vcmask 786112  }
   0x8   :  { %213 = vst [vmem:[#allocation1 + $0x18] sm:$0xff] %v670_v16  ;;  %244 = vst [vmem:[#allocation1 + $0x8] sm:$0xff] %v674_v17  ;;  %s766_s8 = smov 3  ;;  %s768_s9 = smov 12  ;;  %vm404_vm9 = vcmask 720512   ;;  %vm426_vm10 = vcmask 654912  }
   0x9   :  { %101 = vst [vmem:[#allocation1 + $0x50] sm:$0xff] %v653_v18  ;;  %133 = vst [vmem:[#allocation1 + $0x40] sm:$0xff] %v657_v19  ;;  %s698_s10 = smov 120   ;;  %s699_s11 = smov 104   ;;  %vm448_vm11 = vcmask 589312   ;;  %vm470_vm12 = vcmask 523712  }
   0xa   :  { %165 = vst [vmem:[#allocation1 + $0x30] sm:$0xff] %v661_v20  ;;  %197 = vst [vmem:[#allocation1 + $0x20] sm:$0xff] %v665_v21  ;;  %s371_s12 = smov 48  ;;  %s376_s13 = smov 192  ;;  %vm492_vm13 = vcmask 458112   ;;  %vm514_vm14 = vcmask 392512  }
   0xb   :  { %229 = vst [vmem:[#allocation1 + $0x10] sm:$0xff] %v669_v22  ;;  %257 = vst [vmem:[#allocation1] sm:$0xff] %v673_v23  ;;  %s385_s14 = smov 3  ;;  %s700_s15 = smov 112   ;;  %vm536_vm15 = vcmask 326912  }
   0xc   :  { %s388_s16 = smov 12  ;;  %s393_s17 = smov 48 }
   0xd   :  { %s407_s20 = smov 3  ;;  %s410_s21 = smov 12 }
   0xe   :  { %s415_s22 = smov 48  ;;  %s420_s23 = smov 192 }
   0xf   :  { %v276_v24 = vld [vmem:[#allocation1 + $0xf] ss:$16 sm:%s742_s18]   ;;  %v320_v29 = vld [vmem:[#allocation1 + $0xd] ss:$16 sm:%s756_s25]   ;;  %v298_v35 = vld [vmem:[#allocation1 + $0xe] ss:$16 sm:%s297_s29]  }
  0x10   :  { %v279_v25 = vld [vmem:[#allocation1 + $0xf] ss:$16 sm:%s744_s19]   ;;  %v323_v30 = vld [vmem:[#allocation1 + $0xd] ss:$16 sm:%s758_s26]   ;;  %v301_v38 = vld [vmem:[#allocation1 + $0xe] ss:$16 sm:%s300_s30]  }
  0x11   :  { %v284_v26 = vld [vmem:[#allocation1 + $0xf] ss:$16 sm:%s752_s0]   ;;  %v281_v27 = vsel %vm262_vm0, %v279_v25, %v276_v24  ;;  %v325_v32 = vsel %vm262_vm0, %v323_v30, %v320_v29  ;;  %v328_v33 = vld [vmem:[#allocation1 + $0xd] ss:$16 sm:%s760_s27]   ;;  %v306_v39 = vld [vmem:[#allocation1 + $0xe] ss:$16 sm:%s305_s2]   ;;  %v303_v42 = vsel %vm262_vm0, %v301_v38, %v298_v35 }
  0x12   :  { %v289_v28 = vld [vmem:[#allocation1 + $0xf] ss:$16 sm:%s754_s24]   ;;  %v286_v31 = vsel %vm266_vm1, %v284_v26, %v281_v27  ;;  %v333_v34 = vld [vmem:[#allocation1 + $0xd] ss:$16 sm:%s762_s28]   ;;  %v330_v37 = vsel %vm266_vm1, %v328_v33, %v325_v32  ;;  %v311_v40 = vld [vmem:[#allocation1 + $0xe] ss:$16 sm:%s310_s3]   ;;  %v308_v46 = vsel %vm266_vm1, %v306_v39, %v303_v42 }
  0x13   :  { %v291_v36 = vsel %vm270_vm2, %v289_v28, %v286_v31  ;;  %v335_v41 = vsel %vm270_vm2, %v333_v34, %v330_v37  ;;  %v342_v43 = vld [vmem:[#allocation1 + $0xc] ss:$16 sm:%s341_s4]   ;;  %v364_v49 = vld [vmem:[#allocation1 + $0xb] ss:$16 sm:%s766_s8]   ;;  %v313_v51 = vsel %vm270_vm2, %v311_v40, %v308_v46  ;;  %v386_v58 = vld [vmem:[#allocation1 + $0xa] ss:$16 sm:%s385_s14]  }
  0x14   :  { %292 = vrot.lane.b32.xlu0 %v291_v36, %s698_s10  ;;  %v345_v44 = vld [vmem:[#allocation1 + $0xc] ss:$16 sm:%s344_s5]   ;;  %336 = vrot.lane.b32.xlu1 %v335_v41, %s699_s11  ;;  %v367_v50 = vld [vmem:[#allocation1 + $0xb] ss:$16 sm:%s768_s9]   ;;  %s701_s18 = smov 96   ;;  %s398_s19 = smov 192 }
  0x15   :  { %v350_v45 = vld [vmem:[#allocation1 + $0xc] ss:$16 sm:%s349_s6]   ;;  %v347_v47 = vsel %vm262_vm0, %v345_v44, %v342_v43  ;;  %v369_v53 = vsel %vm262_vm0, %v367_v50, %v364_v49  ;;  %v372_v55 = vld [vmem:[#allocation1 + $0xb] ss:$16 sm:%s371_s12]   ;;  %v389_v60 = vld [vmem:[#allocation1 + $0xa] ss:$16 sm:%s388_s16]  }
  0x16   :  { %v355_v48 = vld [vmem:[#allocation1 + $0xc] ss:$16 sm:%s764_s7]   ;;  %v352_v52 = vsel %vm266_vm1, %v350_v45, %v347_v47  ;;  %v377_v56 = vld [vmem:[#allocation1 + $0xb] ss:$16 sm:%s376_s13]   ;;  %v374_v57 = vsel %vm266_vm1, %v372_v55, %v369_v53  ;;  %v394_v61 = vld [vmem:[#allocation1 + $0xa] ss:$16 sm:%s393_s17]   ;;  %v391_v62 = vsel %vm262_vm0, %v389_v60, %v386_v58 }
  0x17   :  { %v357_v54 = vsel %vm270_vm2, %v355_v48, %v352_v52  ;;  %v379_v59 = vsel %vm270_vm2, %v377_v56, %v374_v57  ;;  %v399_v63 = vld [vmem:[#allocation1 + $0xa] ss:$16 sm:%s398_s19]   ;;  %v396_v0 = vsel %vm266_vm1, %v394_v61, %v391_v62  ;;  %v408_v1 = vld [vmem:[#allocation1 + $0x9] ss:$16 sm:%s407_s20]   ;;  %s702_s0 = smov 88   ;;  %s429_s24 = smov 3 }
  0x18   :  { %314 = vrot.lane.b32.xlu0 %v313_v51, %s700_s15  ;;  %358 = vrot.lane.b32.xlu1 %v357_v54, %s701_s18  ;;  %v411_v2 = vld [vmem:[#allocation1 + $0x9] ss:$16 sm:%s410_s21]   ;;  %v401_v3 = vsel %vm270_vm2, %v399_v63, %v396_v0  ;;  %s703_s25 = smov 80   ;;  %v430_v8 = vld [vmem:[#allocation1 + $0x8] ss:$16 sm:%s429_s24]   ;;  %s432_s26 = smov 12 }
  0x19   :  { %v413_v4 = vsel %vm262_vm0, %v411_v2, %v408_v1  ;;  %v416_v5 = vld [vmem:[#allocation1 + $0x9] ss:$16 sm:%s415_s22]   ;;  %s437_s27 = smov 48  ;;  %v433_v10 = vld [vmem:[#allocation1 + $0x8] ss:$16 sm:%s432_s26]   ;;  %s442_s28 = smov 192 }
  0x1a   :  { %v421_v6 = vld [vmem:[#allocation1 + $0x9] ss:$16 sm:%s420_s23]   ;;  %v418_v7 = vsel %vm266_vm1, %v416_v5, %v413_v4  ;;  %v438_v11 = vld [vmem:[#allocation1 + $0x8] ss:$16 sm:%s437_s27]   ;;  %v435_v12 = vsel %vm262_vm0, %v433_v10, %v430_v8  ;;  %s451_s29 = smov 3  ;;  %s454_s30 = smov 12 }
  0x1b   :  { %v423_v9 = vsel %vm270_vm2, %v421_v6, %v418_v7  ;;  %v443_v13 = vld [vmem:[#allocation1 + $0x8] ss:$16 sm:%s442_s28]   ;;  %s704_s2 = smov 72   ;;  %v440_v14 = vsel %vm266_vm1, %v438_v11, %v435_v12  ;;  %v452_v15 = vld [vmem:[#allocation1 + $0x7] ss:$16 sm:%s451_s29]   ;;  %s459_s3 = smov 48 }
  0x1c   :  { %380 = vrot.lane.b32.xlu0 %v379_v59, %s702_s0  ;;  %402 = vrot.lane.b32.xlu1 %v401_v3, %s703_s25  ;;  %v455_v16 = vld [vmem:[#allocation1 + $0x7] ss:$16 sm:%s454_s30]   ;;  %s464_s4 = smov 192  ;;  %v445_v17 = vsel %vm270_vm2, %v443_v13, %v440_v14  ;;  %s473_s5 = smov 3 }
  0x1d   :  { %v457_v18 = vsel %vm262_vm0, %v455_v16, %v452_v15  ;;  %v460_v19 = vld [vmem:[#allocation1 + $0x7] ss:$16 sm:%s459_s3]   ;;  %s705_s6 = smov 64   ;;  %v474_v22 = vld [vmem:[#allocation1 + $0x6] ss:$16 sm:%s473_s5]   ;;  %s476_s7 = smov 12 }
  0x1e   :  { %v465_v20 = vld [vmem:[#allocation1 + $0x7] ss:$16 sm:%s464_s4]   ;;  %v462_v21 = vsel %vm266_vm1, %v460_v19, %v457_v18  ;;  %s481_s8 = smov 48  ;;  %v477_v24 = vld [vmem:[#allocation1 + $0x6] ss:$16 sm:%s476_s7]   ;;  %s486_s9 = smov 192 }
  0x1f   :  { %v467_v23 = vsel %vm270_vm2, %v465_v20, %v462_v21  ;;  %v482_v25 = vld [vmem:[#allocation1 + $0x6] ss:$16 sm:%s481_s8]   ;;  %s706_s10 = smov 56   ;;  %v479_v26 = vsel %vm262_vm0, %v477_v24, %v474_v22  ;;  %s495_s11 = smov 3  ;;  %v713_v24 = vmov 0.0  }
  0x20   :  { %424 = vrot.lane.b32.xlu0 %v423_v9, %s704_s2  ;;  %446 = vrot.lane.b32.xlu1 %v445_v17, %s705_s6  ;;  %v487_v27 = vld [vmem:[#allocation1 + $0x6] ss:$16 sm:%s486_s9]   ;;  %s498_s12 = smov 12  ;;  %v484_v28 = vsel %vm266_vm1, %v482_v25, %v479_v26  ;;  %v496_v29 = vld [vmem:[#allocation1 + $0x5] ss:$16 sm:%s495_s11]   ;;  %s503_s13 = smov 48 }
  0x21   :  { %v499_v30 = vld [vmem:[#allocation1 + $0x5] ss:$16 sm:%s498_s12]   ;;  %s508_s14 = smov 192  ;;  %v489_v31 = vsel %vm270_vm2, %v487_v27, %v484_v28  ;;  %s517_s15 = smov 3 }
  0x22   :  { %v501_v32 = vsel %vm262_vm0, %v499_v30, %v496_v29  ;;  %v504_v33 = vld [vmem:[#allocation1 + $0x5] ss:$16 sm:%s503_s13]   ;;  %s707_s16 = smov 48   ;;  %v518_v36 = vld [vmem:[#allocation1 + $0x4] ss:$16 sm:%s517_s15]   ;;  %s520_s17 = smov 12 }
  0x23   :  { %v509_v34 = vld [vmem:[#allocation1 + $0x5] ss:$16 sm:%s508_s14]   ;;  %v506_v35 = vsel %vm266_vm1, %v504_v33, %v501_v32  ;;  %s525_s18 = smov 48  ;;  %v521_v38 = vld [vmem:[#allocation1 + $0x4] ss:$16 sm:%s520_s17]   ;;  %s530_s19 = smov 192 }
  0x24   :  { %468 = vrot.lane.b32.xlu0 %v467_v23, %s706_s10  ;;  %490 = vrot.lane.b32.xlu1 %v489_v31, %s707_s16  ;;  %v511_v37 = vsel %vm270_vm2, %v509_v34, %v506_v35  ;;  %v526_v39 = vld [vmem:[#allocation1 + $0x4] ss:$16 sm:%s525_s18]   ;;  %s708_s20 = smov 40   ;;  %v523_v40 = vsel %vm262_vm0, %v521_v38, %v518_v36  ;;  %s539_s21 = smov 3 }
  0x25   :  { %v531_v41 = vld [vmem:[#allocation1 + $0x4] ss:$16 sm:%s530_s19]   ;;  %s542_s22 = smov 12  ;;  %v528_v42 = vsel %vm266_vm1, %v526_v39, %v523_v40  ;;  %v540_v43 = vld [vmem:[#allocation1 + $0x3] ss:$16 sm:%s539_s21]   ;;  %s547_s23 = smov 48 }
  0x26   :  { %v543_v44 = vld [vmem:[#allocation1 + $0x3] ss:$16 sm:%s542_s22]   ;;  %s552_s0 = smov 192  ;;  %v533_v45 = vsel %vm270_vm2, %v531_v41, %v528_v42  ;;  %s561_s24 = smov 3 }
  0x27   :  { %v545_v46 = vsel %vm262_vm0, %v543_v44, %v540_v43  ;;  %v548_v47 = vld [vmem:[#allocation1 + $0x3] ss:$16 sm:%s547_s23]   ;;  %s709_s25 = smov 32   ;;  %v562_v50 = vld [vmem:[#allocation1 + $0x2] ss:$16 sm:%s561_s24]   ;;  %s564_s26 = smov 12 }
  0x28   :  { %512 = vrot.lane.b32.xlu0 %v511_v37, %s708_s20  ;;  %v553_v48 = vld [vmem:[#allocation1 + $0x3] ss:$16 sm:%s552_s0]   ;;  %534 = vrot.lane.b32.xlu1 %v533_v45, %s709_s25  ;;  %v550_v49 = vsel %vm266_vm1, %v548_v47, %v545_v46  ;;  %s569_s27 = smov 48  ;;  %v565_v52 = vld [vmem:[#allocation1 + $0x2] ss:$16 sm:%s564_s26]   ;;  %s574_s28 = smov 192 }
  0x29   :  { %v555_v51 = vsel %vm270_vm2, %v553_v48, %v550_v49  ;;  %v570_v53 = vld [vmem:[#allocation1 + $0x2] ss:$16 sm:%s569_s27]   ;;  %s710_s29 = smov 24   ;;  %v567_v54 = vsel %vm262_vm0, %v565_v52, %v562_v50  ;;  %s583_s30 = smov 3 }
  0x2a   :  { %v575_v55 = vld [vmem:[#allocation1 + $0x2] ss:$16 sm:%s574_s28]   ;;  %s586_s2 = smov 12  ;;  %v572_v56 = vsel %vm266_vm1, %v570_v53, %v567_v54  ;;  %v584_v57 = vld [vmem:[#allocation1 + $0x1] ss:$16 sm:%s583_s30]   ;;  %s591_s3 = smov 48 }
  0x2b   :  { %v587_v58 = vld [vmem:[#allocation1 + $0x1] ss:$16 sm:%s586_s2]   ;;  %s596_s4 = smov 192  ;;  %v577_v59 = vsel %vm270_vm2, %v575_v55, %v572_v56  ;;  %s258_s5 = smov 3 }
  0x2c   :  { %556 = vrot.lane.b32.xlu0 %v555_v51, %s710_s29  ;;  %v589_v60 = vsel %vm262_vm0, %v587_v58, %v584_v57  ;;  %v592_v61 = vld [vmem:[#allocation1 + $0x1] ss:$16 sm:%s591_s3]   ;;  %s711_s6 = smov 16   ;;  %s260_s7 = smov 12  ;;  %v259_v0 = vld [vmem:[#allocation1] ss:$16 sm:%s258_s5]  }
  0x2d   :  { %v597_v62 = vld [vmem:[#allocation1 + $0x1] ss:$16 sm:%s596_s4]   ;;  %578 = vrot.lane.b32.xlu1 %v577_v59, %s711_s6  ;;  %v594_v63 = vsel %vm266_vm1, %v592_v61, %v589_v60  ;;  %s264_s8 = smov 48  ;;  %s268_s9 = smov 192  ;;  %v261_v2 = vld [vmem:[#allocation1] ss:$16 sm:%s260_s7]  }
  0x2e   :  { %v599_v1 = vsel %vm270_vm2, %v597_v62, %v594_v63  ;;  %v265_v3 = vld [vmem:[#allocation1] ss:$16 sm:%s264_s8]   ;;  %s712_s10 = smov 8   ;;  %v263_v4 = vsel %vm262_vm0, %v261_v2, %v259_v0  ;;  %vm558_vm0 = vcmask 261312  }
  0x2f   :  { %v269_v5 = vld [vmem:[#allocation1] ss:$16 sm:%s268_s9]   ;;  %v267_v6 = vsel %vm266_vm1, %v265_v3, %v263_v4  ;;  %vm580_vm1 = vcmask 195712  }
  0x30   :  { %600 = vrot.lane.b32.xlu0 %v599_v1, %s712_s10  ;;  %v271_v7 = vsel %vm270_vm2, %v269_v5, %v267_v6  ;;  %vm602_vm2 = vcmask 130112  }
  0x31   :  { %273 = vst.msk [vmem:[#allocation0] sm:$0xff] %vm272_vm3, %v271_v7  }
  0x86   :  { %v293_v8 = vpop.permute.xlu0 %292   ;;  %v337_v9 = vpop.permute.xlu1 %336  }
  0x87   :  { %295 = vst.msk [vmem:[#allocation0] sm:$0xff] %vm294_vm4, %v293_v8  }
  0x8a   :  { %v315_v10 = vpop.permute.xlu0 %314   ;;  %v359_v11 = vpop.permute.xlu1 %358  }
  0x8b   :  { %317 = vst.msk [vmem:[#allocation0] sm:$0xff] %vm316_vm5, %v315_v10  }
  0x8c   :  { %339 = vst.msk [vmem:[#allocation0] sm:$0xff] %vm338_vm6, %v337_v9  }
  0x8d   :  { %361 = vst.msk [vmem:[#allocation0] sm:$0xff] %vm360_vm7, %v359_v11  }
  0x8e   :  { %v381_v12 = vpop.permute.xlu0 %380   ;;  %v403_v13 = vpop.permute.xlu1 %402  }
  0x8f   :  { %383 = vst.msk [vmem:[#allocation0] sm:$0xff] %vm382_vm8, %v381_v12  }
  0x90   :  { %405 = vst.msk [vmem:[#allocation0] sm:$0xff] %vm404_vm9, %v403_v13  }
  0x92   :  { %v425_v14 = vpop.permute.xlu0 %424   ;;  %v447_v15 = vpop.permute.xlu1 %446  }
  0x93   :  { %427 = vst.msk [vmem:[#allocation0] sm:$0xff] %vm426_vm10, %v425_v14  }
  0x94   :  { %449 = vst.msk [vmem:[#allocation0] sm:$0xff] %vm448_vm11, %v447_v15  }
  0x96   :  { %v469_v16 = vpop.permute.xlu0 %468   ;;  %v491_v17 = vpop.permute.xlu1 %490  }
  0x97   :  { %471 = vst.msk [vmem:[#allocation0] sm:$0xff] %vm470_vm12, %v469_v16  }
  0x98   :  { %493 = vst.msk [vmem:[#allocation0] sm:$0xff] %vm492_vm13, %v491_v17  }
  0x9a   :  { %v513_v18 = vpop.permute.xlu0 %512   ;;  %v535_v19 = vpop.permute.xlu1 %534  }
  0x9b   :  { %515 = vst.msk [vmem:[#allocation0] sm:$0xff] %vm514_vm14, %v513_v18  }
  0x9c   :  { %537 = vst.msk [vmem:[#allocation0] sm:$0xff] %vm536_vm15, %v535_v19  }
  0x9e   :  { %v557_v20 = vpop.permute.xlu0 %556  }
  0x9f   :  { %559 = vst.msk [vmem:[#allocation0] sm:$0xff] %vm558_vm0, %v557_v20   ;;  %v579_v21 = vpop.permute.xlu1 %578  }
  0xa0   :  { %581 = vst.msk [vmem:[#allocation0] sm:$0xff] %vm580_vm1, %v579_v21  }
  0xa2   :  { %v601_v22 = vpop.permute.xlu0 %600  }
  0xa3   :  { %603 = vst.msk [vmem:[#allocation0] sm:$0xff] %vm602_vm2, %v601_v22  }
  0xaa   :  { %v609_v23 = vld [vmem:[#allocation0] sm:$0xff] }
  0xab   :  { %v610_v25 = vpack.c.bf16 %v713_v24, %v609_v23 }
  0xad   :  { %613 = vst [vmem:[%s833_s1] sm:$0xf] %v610_v25 }

// kernel: rcab_forward.1
= control target key start
LH: loop header
LB: loop body
LE: loop exit
PB: predicated region body
PF: predicated region fallthrough
CT: control target
= control target key end

     0   :  { %s3084_s30 = smov 0   ;;  %s3827_s0 = inlined_call_operand.vmem [shape: f32[2,16,128], index: 0, kind: input, shape index: {}]   ;;  %s3828_s1 = inlined_call_operand.vmem [shape: bf16[1152,128], index: 1, kind: input, shape index: {}]   ;;  %s3829_s2 = inlined_call_operand.vmem [shape: f32[1,128], index: 2, kind: input, shape index: {}]   ;;  %s3830_s3 = inlined_call_operand.vmem [shape: bf16[1152,128], index: 3, kind: input, shape index: {}]   ;;  %s3831_s4 = inlined_call_operand.vmem [shape: f32[1,128], index: 4, kind: input, shape index: {}]   ;;  %s3832_s5 = inlined_call_operand.vmem [shape: f32[128,2], index: 5, kind: input, shape index: {}]   ;;  %s3833_s6 = inlined_call_operand.vmem [shape: f32[1,2], index: 6, kind: input, shape index: {}]   ;;  %s3834_s7 = inlined_call_operand.vmem [shape: f32[2,128], index: 7, kind: input, shape index: {}]   ;;  %s3835_s8 = inlined_call_operand.vmem [shape: f32[1,128], index: 8, kind: input, shape index: {}]   ;;  %s3836_s9 = inlined_call_operand.vmem [shape: f32[2,16,128], index: 9, kind: output, shape index: {}]  }
   0x1 LB: > { %s2295_s10 = sadd.s32 4294967295, %s3027_s30   ;;  %p2299_p0 = scmp.ge.s32.totalorder %s3027_s30, 1  ;;  %s3027_s30 = sphi %s3084_s30, %s19_s30  }
   0x2   : > { %p287_p1 = scmp.lt.s32.totalorder %s3027_s30, 3 }
   0x4   : > { %p288_p2 = pnand %p2299_p0, %p287_p1 }
   0x5   : > { %p323_p3 = scmp.lt.s32.totalorder (!%p288_p2), %s2295_s10, 1  ;;  %s3029_s16 = smov (!%p288_p2), 8  }
   0x6   : > { %291 = sbr.rel (%p288_p2) target bundleno = 1236 (0x4d4), region = 56  ;;  %s3030_s18 = smov (!%p288_p2), 120  }
   0xb   : > { %v336_v0 = vlaneseq  ;;  %v2871_v1 = vld [vmem:[%s3828_s1 + $0x78] sm:$0xff]   ;;  %s3854_s10 = smov (!%p323_p3, %s2295_s10), 1  ;;  %v2873_v4 = vld [vmem:[%s3828_s1 + $0x70] sm:$0xff]   ;;  %v2877_v12 = vld [vmem:[%s3828_s1 + $0x68] sm:$0xff]   ;;  %vm3031_vm3 = vmmov 1  }
   0xc   : > { %v2872_v3 = vld [vmem:[%s3828_s1 + $0x38] sm:$0xff]   ;;  %2505 = vmatprep.subr.bf16.mxu0 %v2871_v1  ;;  %s2503_s17 = sshll.u32 %s3854_s10, 4  ;;  %v2874_v5 = vld [vmem:[%s3828_s1 + $0x30] sm:$0xff]   ;;  %v2878_v17 = vld [vmem:[%s3828_s1 + $0x28] sm:$0xff]  }
   0xd   : > { %v3097_v2 = vshrl.u32 %v336_v0, 7  ;;  %2506 = vmatpush3.bf16.msra.mxu0 %v2872_v3  ;;  %s3114_s22 = scalar_lea.vmem %s3827_s0, %s2503_s17  ;;  %v2875_v6 = vld [vmem:[%s3828_s1 + $0xf8] sm:$0xff]   ;;  %v2879_v19 = vld [vmem:[%s3828_s1 + $0xf0] sm:$0xff]   ;;  %v3151_v22 = vand.u32 127, %v336_v0  ;;  %v2881_v24 = vld [vmem:[%s3828_s1 + $0x60] sm:$0xff]   ;;  %s332_s14 = scalar_lea.vmem %s3836_s9, %s2503_s17 }
   0xe   : > { %2507 = vmatprep.subr.bf16.mxu0 %v2873_v4  ;;  %v3120_v7 = vld [vmem:[%s3114_s22] sm:$0xff]  ;;  %v3123_v8 = vld [vmem:[%s3114_s22 + $0x8] sm:$0xff]  ;;  %2527 = vmatprep.subr.bf16.mxu1 %v2875_v6  ;;  %v2876_v11 = vld [vmem:[%s3828_s1 + $0xb8] sm:$0xff]  }
   0xf   : > { %vm343_vm0 = vcmp.lt.s32.totalorder %v3097_v2, 1  ;;  %vm350_vm1 = vcmp.ge.s32.totalorder %v3097_v2, 1  ;;  %v341_v9 = vrot.slane %v3120_v7, 7  ;;  %v342_v10 = vrot.slane %v3123_v8, 7  ;;  %2528 = vmatpush3.bf16.msra.mxu1 %v2876_v11  ;;  %v2880_v20 = vld [vmem:[%s3828_s1 + $0xb0] sm:$0xff]   ;;  %v2882_v28 = vld [vmem:[%s3828_s1 + $0x20] sm:$0xff]  }
  0x10   : > { %v380_v13 = vrot.slane %v3120_v7, 1  ;;  %v381_v16 = vrot.slane %v3123_v8, 1  ;;  %vm382_vm2 = vcmp.lt.s32.totalorder %v3097_v2, 7  ;;  %v2816_v23 = vpack.i.bf16 %v3123_v8, %v3120_v7  ;;  %vm3163_vm4 = vmpackc.low %vm3031_vm3, %vm350_vm1  ;;  %2529 = vmatprep.subr.bf16.mxu1 %v2879_v19  ;;  %v2883_v29 = vld [vmem:[%s3828_s1 + $0xe8] sm:$0xff]   ;;  %v2885_v32 = vld [vmem:[%s3828_s1 + $0x58] sm:$0xff]  }
  0x11   : > { %2508 = vmatpush3.bf16.msra.mxu0 %v2874_v5  ;;  %v344_v14 = vsel %vm343_vm0, %v341_v9, %v342_v10  ;;  %v345_v15 = vsel %vm343_vm0, %v342_v10, %v341_v9  ;;  %vm352_vm5 = vcmp.ge.s32.totalorder %v3151_v22, 8  ;;  %v2884_v30 = vld [vmem:[%s3828_s1 + $0xa8] sm:$0xff]   ;;  %v2886_v33 = vld [vmem:[%s3828_s1 + $0x18] sm:$0xff]   ;;  %v2887_v34 = vld [vmem:[%s3828_s1 + $0xe0] sm:$0xff]   ;;  %vm363_vm8 = vcmp.lt.s32.totalorder %v3151_v22, 120 }
  0x12   : > { %2509 = vmatprep.subr.bf16.mxu0 %v2877_v12  ;;  %v2811_v18 = vpack.i.bf16 %v344_v14, %v345_v15  ;;  %v2378_v21 = vpack.c.bf16 %v344_v14, %v345_v15  ;;  %v3169_v26 = vsel %vm382_vm2, %v380_v13, %v381_v16  ;;  %v3173_v27 = vsel %vm382_vm2, %v381_v16, %v380_v13  ;;  %vm353_vm6 = vmand %vm350_vm1, %vm352_vm5  ;;  %v2888_v35 = vld [vmem:[%s3828_s1 + $0xa0] sm:$0xff]   ;;  %v2889_v37 = vld [vmem:[%s3828_s1 + $0x50] sm:$0xff]  }
  0x13   : > { %2530 = vmatpush3.bf16.msra.mxu1 %v2880_v20  ;;  %v2831_v31 = vpack.i.bf16 %v3173_v27, %v3169_v26  ;;  %vm3211_vm7 = vmpackc.low %vm352_vm5, %vm353_vm6  ;;  %v2890_v38 = vld [vmem:[%s3828_s1 + $0x10] sm:$0xff]   ;;  %v2891_v39 = vld [vmem:[%s3828_s1 + $0xd8] sm:$0xff]   ;;  %v2393_v52 = vpack.c.bf16 %v3173_v27, %v3169_v26  ;;  %v3277_v59 = vadd.s32 8, %v3097_v2 }
  0x14   : > { %2812 = vrot.lane.b32.xlu0 %v2811_v18, %s3029_s16  ;;  %2822 = vrot.lane.b32.xlu1 %v2811_v18, %s3030_s18  ;;  %v2892_v40 = vld [vmem:[%s3828_s1 + $0x98] sm:$0xff]   ;;  %v2893_v41 = vld [vmem:[%s3828_s1 + $0x48] sm:$0xff]   ;;  %vm364_vm9 = vmand %vm350_vm1, %vm363_vm8  ;;  %vm3033_vm1 = vmmov 0  }
  0x15   : > { %2510 = vmatpush3.bf16.msra.mxu0 %v2878_v17  ;;  %2379 = vmatprep.mubr.msk.bf16.mxu0 %vm3163_vm4, %v2378_v21  ;;  %v2894_v42 = vld [vmem:[%s3828_s1 + $0x8] sm:$0xff]   ;;  %v2895_v43 = vld [vmem:[%s3828_s1 + $0xd0] sm:$0xff]   ;;  %v2897_v45 = vld [vmem:[%s3828_s1 + $0x40] sm:$0xff]   ;;  %vm390_vm12 = vcmp.le.s32.totalorder %v3277_v59, 14 }
  0x16   : > { %2511 = vmatprep.subr.bf16.mxu0 %v2881_v24  ;;  %2531 = vmatprep.subr.bf16.mxu1 %v2883_v29  ;;  %v2896_v44 = vld [vmem:[%s3828_s1 + $0x90] sm:$0xff]   ;;  %v2898_v46 = vld [vmem:[%s3828_s1] sm:$0xff]   ;;  %v2899_v47 = vld [vmem:[%s3828_s1 + $0xc8] sm:$0xff]  }
  0x17   : > { %2532 = vmatpush3.bf16.msra.mxu1 %v2884_v30  ;;  %v2900_v48 = vld [vmem:[%s3828_s1 + $0x88] sm:$0xff]   ;;  %v2901_v49 = vld [vmem:[%s3828_s1 + $0x178] sm:$0xff]   ;;  %v2902_v50 = vld [vmem:[%s3828_s1 + $0xc0] sm:$0xff]  }
  0x18   : > { %2817 = vrot.lane.b32.xlu0 %v2816_v23, %s3029_s16  ;;  %2827 = vrot.lane.b32.xlu1 %v2816_v23, %s3030_s18  ;;  %v2904_v51 = vld [vmem:[%s3828_s1 + $0x80] sm:$0xff]   ;;  %v2907_v53 = vld [vmem:[%s3828_s1 + $0x1f8] sm:$0xff]   ;;  %vm3272_vm10 = vmpackc.low %vm363_vm8, %vm364_vm9 }
  0x19   : > { %2512 = vmatpush3.bf16.msra.mxu0 %v2882_v28  ;;  %2533 = vmatprep.subr.bf16.mxu1 %v2887_v34  ;;  %v2903_v62 = vld [vmem:[%s3828_s1 + $0x138] sm:$0xff]   ;;  %v2905_v0 = vld [vmem:[%s3828_s1 + $0x170] sm:$0xff]   ;;  %vm3290_vm11 = vmpackc.low %vm352_vm5, %vm352_vm5 }
  0x1a   : > { %2513 = vmatprep.subr.bf16.mxu0 %v2885_v32  ;;  %v2906_v12 = vld [vmem:[%s3828_s1 + $0x130] sm:$0xff]   ;;  %vm3301_vm13 = vmpackc.low %vm363_vm8, %vm363_vm8  ;;  %v2908_v15 = vld [vmem:[%s3828_s1 + $0x1b8] sm:$0xff]  }
  0x1b   : > { %2534 = vmatpush3.bf16.msra.mxu1 %v2888_v35  ;;  %v2909_v16 = vld [vmem:[%s3828_s1 + $0x168] sm:$0xff]   ;;  %v2911_v18 = vld [vmem:[%s3828_s1 + $0x1f0] sm:$0xff]   ;;  %vm3317_vm14 = vmpackc.low %vm390_vm12, %vm3031_vm3 }
  0x1c   : > { %2832 = vrot.lane.b32.xlu0 %v2831_v31, %s3029_s16  ;;  %2837 = vrot.lane.b32.xlu1 %v2831_v31, %s3030_s18  ;;  %v2910_v20 = vld [vmem:[%s3828_s1 + $0x128] sm:$0xff]   ;;  %v2912_v21 = vld [vmem:[%s3828_s1 + $0x1b0] sm:$0xff]   ;;  %vm392_vm15 = vmand %vm390_vm12, %vm352_vm5 }
  0x1d   : > { %2514 = vmatpush3.bf16.msra.mxu0 %v2886_v33  ;;  %2535 = vmatprep.subr.bf16.mxu1 %v2891_v39  ;;  %v2913_v23 = vld [vmem:[%s3828_s1 + $0x160] sm:$0xff]   ;;  %v2915_v24 = vld [vmem:[%s3828_s1 + $0x1e8] sm:$0xff]   ;;  %v2917_v28 = vld [vmem:[%s3828_s1 + $0x158] sm:$0xff]  }
  0x1e   : > { %2515 = vmatprep.subr.bf16.mxu0 %v2889_v37  ;;  %v2914_v26 = vld [vmem:[%s3828_s1 + $0x120] sm:$0xff]   ;;  %v2916_v27 = vld [vmem:[%s3828_s1 + $0x1a8] sm:$0xff]   ;;  %v2918_v30 = vld [vmem:[%s3828_s1 + $0x118] sm:$0xff]  }
  0x1f   : > { %2536 = vmatpush3.bf16.msra.mxu1 %v2892_v40  ;;  %v2919_v29 = vld [vmem:[%s3828_s1 + $0x1e0] sm:$0xff]   ;;  %v2921_v32 = vld [vmem:[%s3828_s1 + $0x150] sm:$0xff]   ;;  %v2923_v33 = vld [vmem:[%s3828_s1 + $0x1d8] sm:$0xff]  }
  0x20   : > { %2537 = vmatprep.subr.bf16.mxu1 %v2895_v43  ;;  %v2920_v31 = vld [vmem:[%s3828_s1 + $0x1a0] sm:$0xff]   ;;  %v2922_v34 = vld [vmem:[%s3828_s1 + $0x110] sm:$0xff]   ;;  %v2924_v35 = vld [vmem:[%s3828_s1 + $0x198] sm:$0xff]  }
  0x21   : > { %2516 = vmatpush3.bf16.msra.mxu0 %v2890_v38  ;;  %v2925_v37 = vld [vmem:[%s3828_s1 + $0x148] sm:$0xff]   ;;  %v2927_v38 = vld [vmem:[%s3828_s1 + $0x1d0] sm:$0xff]   ;;  %v2930_v43 = vld [vmem:[%s3828_s1 + $0x100] sm:$0xff]  }
  0x22   : > { %2517 = vmatprep.subr.bf16.mxu0 %v2893_v41  ;;  %v2926_v39 = vld [vmem:[%s3828_s1 + $0x108] sm:$0xff]   ;;  %v2928_v40 = vld [vmem:[%s3828_s1 + $0x190] sm:$0xff]   ;;  %v2929_v41 = vld [vmem:[%s3828_s1 + $0x140] sm:$0xff]  }
  0x23   : > { %2538 = vmatpush3.bf16.msra.mxu1 %v2896_v44  ;;  %v2932_v44 = vld [vmem:[%s3828_s1 + $0x188] sm:$0xff]   ;;  %vm3419_vm3 = vmpackc.low %vm392_vm15, %vm352_vm5  ;;  %v2944_v59 = vld [vmem:[%s3830_s3 + $0x38] sm:$0xff]  }
  0x24   : > { %2539 = vmatprep.subr.bf16.mxu1 %v2899_v47  ;;  %v409_v47 = vpack.c.bf16 %v3123_v8, %v3120_v7  ;;  %v2936_v8 = vld [vmem:[%s3828_s1 + $0x230] sm:$0xff]   ;;  %vm402_vm5 = vmand %vm390_vm12, %vm363_vm8  ;;  %v2946_v22 = vld [vmem:[%s3830_s3 + $0xf8] sm:$0xff]  }
  0x25   : > { %2518 = vmatpush3.bf16.msra.mxu0 %v2894_v42  ;;  %v2931_v42 = vld [vmem:[%s3828_s1 + $0x1c8] sm:$0xff]   ;;  %vm3455_vm6 = vmpackc.low %vm402_vm5, %vm363_vm8  ;;  %v2979_v6 = vld [vmem:[%s3830_s3 + $0x130] sm:$0xff]  }
  0x26   : > { %2519 = vmatprep.subr.bf16.mxu0 %v2897_v45  ;;  %v2982_v36 = vld [vmem:[%s3830_s3 + $0x1f0] sm:$0xff]   ;;  %v2983_v13 = vld [vmem:[%s3830_s3 + $0x128] sm:$0xff]  }
  0x27   : > { %2540 = vmatpush3.bf16.msra.mxu1 %v2900_v48  ;;  %v2986_v54 = vld [vmem:[%s3830_s3 + $0x1e8] sm:$0xff]  }
  0x28   : > { %2541 = vmatprep.subr.bf16.mxu1 %v2902_v50  ;;  %v2934_v50 = vld [vmem:[%s3828_s1 + $0x238] sm:$0xff]   ;;  %v2988_v19 = vld [vmem:[%s3830_s3 + $0x1a8] sm:$0xff]  }
  0x29   : > { %2520 = vmatpush3.bf16.msra.mxu0 %v2898_v46  ;;  %v2933_v46 = vld [vmem:[%s3828_s1 + $0x1c0] sm:$0xff]  }
  0x2a   : > { %2549 = vmatprep.subr.bf16.mxu0 %v2901_v49 }
  0x2b   : > { %2542 = vmatpush3.bf16.msra.mxu1 %v2904_v51  ;;  %v3032_v51 = vmov 0.0  }
  0x2c   : > { %2571 = vmatprep.subr.bf16.mxu1 %v2907_v53  ;;  %v3011_v53 = vld [vmem:[%s3830_s3 + $0x218] sm:$0xff]  }
  0x86   : > { %v2813_v55 = vpop.permute.xlu0 %2812  ;;  %v2823_v56 = vpop.permute.xlu1 %2822 }
  0x87   : > { %v2815_v57 = vunpack.i.h.bf16 %v2813_v55  ;;  %v2814_v58 = vunpack.i.l.bf16 %v2813_v55  ;;  %v2825_v60 = vunpack.i.h.bf16 %v2823_v56  ;;  %v2824_v61 = vunpack.i.l.bf16 %v2823_v56  ;;  %v2937_v55 = vld [vmem:[%s3828_s1 + $0x228] sm:$0xff]   ;;  %v2938_v56 = vld [vmem:[%s3828_s1 + $0x220] sm:$0xff]  }
  0x89   : > { %v2381_v63 = vpack.c.bf16 %v2815_v57, %v2814_v58  ;;  %v2387_v11 = vpack.c.bf16 %v2825_v60, %v2824_v61  ;;  %v2939_v57 = vld [vmem:[%s3828_s1 + $0x218] sm:$0xff]   ;;  %v2940_v58 = vld [vmem:[%s3828_s1 + $0x210] sm:$0xff]   ;;  %v2941_v60 = vld [vmem:[%s3828_s1 + $0x208] sm:$0xff]  }
  0x8a   : > { %v2818_v1 = vpop.permute.xlu0 %2817  ;;  %v2828_v3 = vpop.permute.xlu1 %2827 }
  0x8b   : > { %v2820_v4 = vunpack.i.h.bf16 %v2818_v1  ;;  %v2819_v5 = vunpack.i.l.bf16 %v2818_v1  ;;  %2382 = vmatmul.mubr.msk.bf16.vlgmr.msra.gmra.mxu0 %vm3211_vm7, %v2381_v63  ;;  %v2830_v9 = vunpack.i.h.bf16 %v2828_v3  ;;  %v2829_v10 = vunpack.i.l.bf16 %v2828_v3  ;;  %v2068_v3 = vld [vmem:[%s3832_s5 + $0x60] sm:$0xff] }
  0x8c   : > { %2550 = vmatpush3.bf16.msra.mxu0 %v2903_v62 }
  0x8d   : > { %2551 = vmatprep.subr.bf16.mxu0 %v2905_v0  ;;  %v2384_v14 = vpack.c.bf16 %v2820_v4, %v2819_v5  ;;  %v2390_v17 = vpack.c.bf16 %v2830_v9, %v2829_v10  ;;  %v2942_v0 = vld [vmem:[%s3828_s1 + $0x200] sm:$0xff]   ;;  %v2943_v4 = vld [vmem:[%s3830_s3 + $0x78] sm:$0xff]   ;;  %v2945_v5 = vld [vmem:[%s3830_s3 + $0x70] sm:$0xff]  }
  0x8e   : > { %v2833_v45 = vpop.permute.xlu0 %2832  ;;  %v2838_v61 = vpop.permute.xlu1 %2837  ;;  %v2948_v9 = vld [vmem:[%s3830_s3 + $0xb8] sm:$0xff]   ;;  %v2950_v10 = vld [vmem:[%s3830_s3 + $0xf0] sm:$0xff]  }
  0x8f   : > { %2385 = vmatprep.mubr.msk.bf16.mxu1 %vm3290_vm11, %v2384_v14  ;;  %2391 = vmatprep.mubr.msk.bf16.mxu0 %vm3301_vm13, %v2390_v17  ;;  %v2835_v48 = vunpack.i.h.bf16 %v2833_v45  ;;  %v2834_v49 = vunpack.i.l.bf16 %v2833_v45  ;;  %v2840_v62 = vunpack.i.h.bf16 %v2838_v61  ;;  %v2839_v63 = vunpack.i.l.bf16 %v2838_v61  ;;  %v2952_v14 = vld [vmem:[%s3830_s3 + $0xb0] sm:$0xff]   ;;  %v2953_v17 = vld [vmem:[%s3830_s3 + $0x60] sm:$0xff]  }
  0x90   : > { %2552 = vmatpush3.bf16.msra.mxu0 %v2906_v12  ;;  %2388 = vmatmul.mubr.msk.bf16.vlgmr.msra.gmra.mxu1 %vm3272_vm10, %v2387_v11  ;;  %v2947_v11 = vld [vmem:[%s3830_s3 + $0x30] sm:$0xff]   ;;  %v2949_v12 = vld [vmem:[%s3830_s3 + $0x68] sm:$0xff]  }
  0x91   : > { %2572 = vmatpush3.bf16.msra.mxu1 %v2908_v15  ;;  %2553 = vmatprep.subr.bf16.mxu0 %v2909_v16  ;;  %v2396_v7 = vpack.c.bf16 %v2835_v48, %v2834_v49  ;;  %v2399_v1 = vpack.c.bf16 %v2840_v62, %v2839_v63  ;;  %v2954_v15 = vld [vmem:[%s3830_s3 + $0xe8] sm:$0xff]   ;;  %v2304_v49 = vld [vmem:[%s3829_s2] ss:$0 sm:$0xff] }
  0x92   : > { %2573 = vmatprep.subr.bf16.mxu1 %v2911_v18  ;;  %2394 = vmatprep.mubr.msk.bf16.mxu1 %vm3317_vm14, %v2393_v52  ;;  %v2935_v52 = vld [vmem:[%s3828_s1 + $0x180] sm:$0xff]   ;;  %v2951_v16 = vld [vmem:[%s3830_s3 + $0x28] sm:$0xff]  }
  0x93   : > { %v2956_v18 = vld [vmem:[%s3830_s3 + $0xa8] sm:$0xff]  }
  0x94   : > { %2554 = vmatpush3.bf16.msra.mxu0 %v2910_v20  ;;  %v2958_v20 = vld [vmem:[%s3830_s3 + $0xe0] sm:$0xff]  }
  0x95   : > { %2574 = vmatpush3.bf16.msra.mxu1 %v2912_v21  ;;  %2555 = vmatprep.subr.bf16.mxu0 %v2913_v23  ;;  %v2955_v21 = vld [vmem:[%s3830_s3 + $0x20] sm:$0xff]   ;;  %v2957_v23 = vld [vmem:[%s3830_s3 + $0x58] sm:$0xff]  }
  0x96   : > { %2575 = vmatprep.subr.bf16.mxu1 %v2915_v24  ;;  %v2960_v24 = vld [vmem:[%s3830_s3 + $0xa0] sm:$0xff]  }
  0x98   : > { %2556 = vmatpush3.bf16.msra.mxu0 %v2914_v26  ;;  %v2962_v26 = vld [vmem:[%s3830_s3 + $0xd8] sm:$0xff]  }
  0x99   : > { %2576 = vmatpush3.bf16.msra.mxu1 %v2916_v27  ;;  %2557 = vmatprep.subr.bf16.mxu0 %v2917_v28  ;;  %v2959_v27 = vld [vmem:[%s3830_s3 + $0x18] sm:$0xff]   ;;  %v2961_v28 = vld [vmem:[%s3830_s3 + $0x50] sm:$0xff]  }
  0x9a   : > { %2577 = vmatprep.subr.bf16.mxu1 %v2919_v29  ;;  %v2964_v29 = vld [vmem:[%s3830_s3 + $0x98] sm:$0xff]  }
  0x9c   : > { %2558 = vmatpush3.bf16.msra.mxu0 %v2918_v30  ;;  %v2966_v30 = vld [vmem:[%s3830_s3 + $0xd0] sm:$0xff]  }
  0x9d   : > { %2578 = vmatpush3.bf16.msra.mxu1 %v2920_v31  ;;  %2559 = vmatprep.subr.bf16.mxu0 %v2921_v32  ;;  %v2963_v31 = vld [vmem:[%s3830_s3 + $0x10] sm:$0xff]   ;;  %v2965_v32 = vld [vmem:[%s3830_s3 + $0x48] sm:$0xff]  }
  0x9e   : > { %2579 = vmatprep.subr.bf16.mxu1 %v2923_v33  ;;  %v2968_v33 = vld [vmem:[%s3830_s3 + $0x90] sm:$0xff]  }
  0xa0   : > { %2560 = vmatpush3.bf16.msra.mxu0 %v2922_v34  ;;  %v2967_v34 = vld [vmem:[%s3830_s3 + $0x8] sm:$0xff]  }
  0xa1   : > { %2580 = vmatpush3.bf16.msra.mxu1 %v2924_v35  ;;  %2561 = vmatprep.subr.bf16.mxu0 %v2925_v37 }
  0xa2   : > { %2581 = vmatprep.subr.bf16.mxu1 %v2927_v38 }
  0xa4   : > { %2562 = vmatpush3.bf16.msra.mxu0 %v2926_v39 }
  0xa5   : > { %2582 = vmatpush3.bf16.msra.mxu1 %v2928_v40  ;;  %2563 = vmatprep.subr.bf16.mxu0 %v2929_v41 }
  0xa6   : > { %2583 = vmatprep.subr.bf16.mxu1 %v2931_v42 }
  0xa8   : > { %2564 = vmatpush3.bf16.msra.mxu0 %v2930_v43 }
  0xa9   : > { %2584 = vmatpush3.bf16.msra.mxu1 %v2932_v44  ;;  %2718 = vmatprep.subr.bf16.mxu0 %v3032_v51 }
  0xaa   : > { %2585 = vmatprep.subr.bf16.mxu1 %v2933_v46 }
  0xab   : > { %1112 = vmatmul.mubr.bf16.vlgmr.msra.gmra.mxu0 %v409_v47 }
  0xac   : > { %2719 = vmatpush3.bf16.msra.mxu0 %v2934_v50  ;;  %2734 = vmatprep.mubr.msk.bf16.mxu0 %vm3033_vm1, %v3032_v51 }
  0xad   : > { %2586 = vmatpush3.bf16.msra.mxu1 %v2935_v52  ;;  %2720 = vmatprep.subr.bf16.mxu0 %v3032_v51 }
  0xae   : > { %2602 = vmatprep.subr.bf16.mxu1 %v2943_v4 }
  0xb0   : > { %2397 = vmatmul.mubr.msk.bf16.vlgmr.msra.gmra.mxu1 %vm3419_vm3, %v2396_v7  ;;  %2721 = vmatpush3.bf16.msra.mxu0 %v2936_v8 }
  0xb1   : > { %2722 = vmatprep.subr.bf16.mxu0 %v3032_v51  ;;  %2603 = vmatpush3.bf16.msra.mxu1 %v2944_v59 }
  0xb2   : > { %2604 = vmatprep.subr.bf16.mxu1 %v2945_v5 }
  0xb4   : > { %2723 = vmatpush3.bf16.msra.mxu0 %v2937_v55 }
  0xb5   : > { %2724 = vmatprep.subr.bf16.mxu0 %v3032_v51  ;;  %2605 = vmatpush3.bf16.msra.mxu1 %v2947_v11  ;;  %v2971_v11 = vld [vmem:[%s3830_s3] sm:$0xff]  }
  0xb6   : > { %2606 = vmatprep.subr.bf16.mxu1 %v2949_v12  ;;  %v2972_v12 = vld [vmem:[%s3830_s3 + $0x88] sm:$0xff]  }
  0xb8   : > { %2725 = vmatpush3.bf16.msra.mxu0 %v2938_v56 }
  0xb9   : > { %2726 = vmatprep.subr.bf16.mxu0 %v3032_v51  ;;  %2607 = vmatpush3.bf16.msra.mxu1 %v2951_v16 }
  0xba   : > { %2608 = vmatprep.subr.bf16.mxu1 %v2953_v17 }
  0xbc   : > { %2727 = vmatpush3.bf16.msra.mxu0 %v2939_v57 }
  0xbd   : > { %2728 = vmatprep.subr.bf16.mxu0 %v3032_v51  ;;  %2609 = vmatpush3.bf16.msra.mxu1 %v2955_v21 }
  0xbe   : > { %2610 = vmatprep.subr.bf16.mxu1 %v2957_v23 }
  0xc0   : > { %2729 = vmatpush3.bf16.msra.mxu0 %v2940_v58 }
  0xc1   : > { %2730 = vmatprep.subr.bf16.mxu0 %v3032_v51  ;;  %2611 = vmatpush3.bf16.msra.mxu1 %v2959_v27 }
  0xc2   : > { %2612 = vmatprep.subr.bf16.mxu1 %v2961_v28 }
  0xc4   : > { %2731 = vmatpush3.bf16.msra.mxu0 %v2941_v60 }
  0xc5   : > { %2732 = vmatprep.subr.bf16.mxu0 %v3032_v51  ;;  %2613 = vmatpush3.bf16.msra.mxu1 %v2963_v31 }
  0xc6   : > { %2614 = vmatprep.subr.bf16.mxu1 %v2965_v32 }
  0xc8   : > { %2733 = vmatpush3.bf16.msra.mxu0 %v2942_v0 }
  0xc9   : > { %2624 = vmatprep.subr.bf16.mxu0 %v2946_v22  ;;  %2615 = vmatpush3.bf16.msra.mxu1 %v2967_v34  ;;  %v2969_v22 = vld [vmem:[%s3830_s3 + $0x40] sm:$0xff]  }
  0xca   : > { %2616 = vmatprep.subr.bf16.mxu1 %v2969_v22  ;;  %v2989_v22 = vld [vmem:[%s3830_s3 + $0x158] sm:$0xff]  }
  0xcb   : > { %2735 = vmatmul.mubr.msk.bf16.vlgmr.msra.gmra.mxu0 %vm3455_vm6, %v2399_v1 }
  0xcc   : > { %2625 = vmatpush3.bf16.msra.mxu0 %v2948_v9  ;;  %v2970_v9 = vld [vmem:[%s3830_s3 + $0xc8] sm:$0xff]  }
  0xcd   : > { %2626 = vmatprep.subr.bf16.mxu0 %v2950_v10  ;;  %2617 = vmatpush3.bf16.msra.mxu1 %v2971_v11  ;;  %v2992_v11 = vld [vmem:[%s3830_s3 + $0x1a0] sm:$0xff]  }
  0xd0   : > { %2627 = vmatpush3.bf16.msra.mxu0 %v2952_v14 }
  0xd1   : > { %2628 = vmatprep.subr.bf16.mxu0 %v2954_v15 }
  0xd4   : > { %2629 = vmatpush3.bf16.msra.mxu0 %v2956_v18  ;;  %v2973_v18 = vld [vmem:[%s3830_s3 + $0xc0] sm:$0xff]  }
  0xd5   : > { %2630 = vmatprep.subr.bf16.mxu0 %v2958_v20  ;;  %v2974_v20 = vld [vmem:[%s3830_s3 + $0x178] sm:$0xff]  }
  0xd6   : > { %2646 = vmatprep.subr.bf16.mxu1 %v2974_v20  ;;  %v2999_v20 = vld [vmem:[%s3830_s3 + $0x108] sm:$0xff]  }
  0xd8   : > { %2631 = vmatpush3.bf16.msra.mxu0 %v2960_v24  ;;  %v2975_v24 = vld [vmem:[%s3830_s3 + $0x80] sm:$0xff]  }
  0xd9   : > { %2632 = vmatprep.subr.bf16.mxu0 %v2962_v26 }
  0xdc   : > { %2633 = vmatpush3.bf16.msra.mxu0 %v2964_v29  ;;  %v2977_v29 = vld [vmem:[%s3830_s3 + $0x1f8] sm:$0xff]  }
  0xdd   : > { %2634 = vmatprep.subr.bf16.mxu0 %v2966_v30 }
  0xe0   : > { %2635 = vmatpush3.bf16.msra.mxu0 %v2968_v33 }
  0xe1   : > { %2636 = vmatprep.subr.bf16.mxu0 %v2970_v9  ;;  %v2990_v9 = vld [vmem:[%s3830_s3 + $0x1e0] sm:$0xff]  }
  0xe4   : > { %2637 = vmatpush3.bf16.msra.mxu0 %v2972_v12  ;;  %v2993_v12 = vld [vmem:[%s3830_s3 + $0x150] sm:$0xff]  }
  0xe5   : > { %2638 = vmatprep.subr.bf16.mxu0 %v2973_v18  ;;  %v2998_v18 = vld [vmem:[%s3830_s3 + $0x1d0] sm:$0xff]  }
  0xe8   : > { %2639 = vmatpush3.bf16.msra.mxu0 %v2975_v24  ;;  %v3001_v24 = vld [vmem:[%s3830_s3 + $0x140] sm:$0xff]  }
  0xe9   : > { %2668 = vmatprep.subr.bf16.mxu0 %v2977_v29  ;;  %v3004_v29 = vld [vmem:[%s3830_s3 + $0x188] sm:$0xff]  }
 0x14b   : > { %v2521_v35 = vpop.f32.mrf.mxu0 }
 0x14d   : > { %v2522_v38 = vpop.f32.mrf.mxu0 }
 0x14e   : > { %v2523_v48 = vadd.f32 %v2522_v38, %v2521_v35 }
 0x14f   : > { %v2524_v40 = vpop.f32.mrf.mxu0 }
 0x150   : > { %v2543_v37 = vpop.f32.mrf.mxu1  ;;  %v1032_v8 = vadd.f32 %v2523_v48, %v2304_v49 }
 0x151   : > { %v2525_v42 = vpop.f32.mrf.mxu0 }
 0x152   : > { %v2544_v39 = vpop.f32.mrf.mxu1  ;;  %v2526_v55 = vadd.f32 %v2525_v42, %v2524_v40 }
 0x153   : > { %v2545_v52 = vadd.f32 %v2544_v39, %v2543_v37 }
 0x154   : > { %v2546_v41 = vpop.f32.mrf.mxu1  ;;  %v1035_v63 = vadd.f32 %v2526_v55, %v2304_v49  ;;  %v2976_v55 = vld [vmem:[%s3830_s3 + $0x138] sm:$0xff]  }
 0x155   : > { %v1073_v58 = vadd.f32 %v2545_v52, %v1032_v8 }
 0x156   : > { %v2547_v43 = vpop.f32.mrf.mxu1 }
 0x157   : > { %v2548_v60 = vadd.f32 %v2547_v43, %v2546_v41 }
 0x159   : > { %v1076_v4 = vadd.f32 %v2548_v60, %v1035_v63  ;;  %v2980_v63 = vld [vmem:[%s3830_s3 + $0x1b8] sm:$0xff]  }
 0x16b   : > { %v2565_v44 = vpop.f32.mrf.mxu0 }
 0x16d   : > { %v2566_v46 = vpop.f32.mrf.mxu0 }
 0x16e   : > { %v2567_v56 = vadd.f32 %v2566_v46, %v2565_v44 }
 0x16f   : > { %v2568_v50 = vpop.f32.mrf.mxu0 }
 0x170   : > { %v2587_v45 = vpop.f32.mrf.mxu1  ;;  %v1114_v0 = vadd.f32 %v2567_v56, %v1073_v58 }
 0x171   : > { %v2569_v57 = vpop.f32.mrf.mxu0 }
 0x172   : > { %v2588_v47 = vpop.f32.mrf.mxu1  ;;  %v2570_v1 = vadd.f32 %v2569_v57, %v2568_v50  ;;  %v2978_v57 = vld [vmem:[%s3830_s3 + $0x170] sm:$0xff]  }
 0x173   : > { %v2589_v61 = vadd.f32 %v2588_v47, %v2587_v45 }
 0x174   : > { %v2590_v7 = vpop.f32.mrf.mxu1  ;;  %v1117_v14 = vadd.f32 %v2570_v1, %v1076_v4  ;;  %v2981_v1 = vld [vmem:[%s3830_s3 + $0x168] sm:$0xff]   ;;  %v2984_v4 = vld [vmem:[%s3830_s3 + $0x1b0] sm:$0xff]  }
 0x175   : > { %v1155_v5 = vadd.f32 %v2589_v61, %v1114_v0 }
 0x176   : > { %v2591_v62 = vpop.f32.mrf.mxu1 }
 0x177   : > { %v2592_v59 = vadd.f32 %v2591_v62, %v2590_v7 }
 0x179   : > { %v1158_v17 = vadd.f32 %v2592_v59, %v1117_v14  ;;  %v2985_v59 = vld [vmem:[%s3830_s3 + $0x160] sm:$0xff]   ;;  %v2994_v14 = vld [vmem:[%s3830_s3 + $0x1d8] sm:$0xff]  }
 0x18b   : > { %v1195_v10 = vpop.f32.mrf.mxu0 }
 0x18c   : > { %v1196_v15 = vadd.f32 %v1195_v10, %v1155_v5  ;;  %v2987_v5 = vld [vmem:[%s3830_s3 + $0x120] sm:$0xff]   ;;  %v2991_v10 = vld [vmem:[%s3830_s3 + $0x118] sm:$0xff]  }
 0x18d   : > { %v2736_v16 = vpop.f32.mrf.mxu0 }
 0x18e   : > { %v3560_v21 = vmax.f32 %v1196_v15, 0.0  ;;  %v2995_v15 = vld [vmem:[%s3830_s3 + $0x110] sm:$0xff]   ;;  %v2996_v16 = vld [vmem:[%s3830_s3 + $0x198] sm:$0xff]  }
 0x18f   : > { %v1198_v23 = vpop.f32.mrf.mxu0 }
 0x190   : > { %v1199_v26 = vadd.f32 %v1198_v23, %v1158_v17  ;;  %v1204_v30 = vrot.slane %v3560_v21, 7  ;;  %v1234_v33 = vrot.slane %v3560_v21, 1  ;;  %v2997_v17 = vld [vmem:[%s3830_s3 + $0x148] sm:$0xff]   ;;  %v3000_v23 = vld [vmem:[%s3830_s3 + $0x190] sm:$0xff]  }
 0x191   : > { %v2737_v27 = vpop.f32.mrf.mxu0 }
 0x192   : > { %v3565_v28 = vmax.f32 %v1199_v26, 0.0  ;;  %v3002_v26 = vld [vmem:[%s3830_s3 + $0x1c8] sm:$0xff]   ;;  %v3003_v27 = vld [vmem:[%s3830_s3 + $0x100] sm:$0xff]  }
 0x194   : > { %v2846_v31 = vpack.i.bf16 %v3565_v28, %v3560_v21  ;;  %v1205_v32 = vrot.slane %v3565_v28, 7  ;;  %v1235_v34 = vrot.slane %v3565_v28, 1  ;;  %v1256_v35 = vpack.c.bf16 %v3565_v28, %v3560_v21  ;;  %v3009_v21 = vld [vmem:[%s3830_s3 + $0x228] sm:$0xff]   ;;  %v3010_v28 = vld [vmem:[%s3830_s3 + $0x220] sm:$0xff]  }
 0x196   : > { %2847 = vrot.lane.b32.xlu1 %v2846_v31, %s3029_s16  ;;  %v1206_v37 = vsel %vm343_vm0, %v1204_v30, %v1205_v32  ;;  %v1207_v38 = vsel %vm343_vm0, %v1205_v32, %v1204_v30  ;;  %v1236_v39 = vsel %vm382_vm2, %v1234_v33, %v1235_v34  ;;  %v1237_v40 = vsel %vm382_vm2, %v1235_v34, %v1234_v33  ;;  %v3005_v30 = vld [vmem:[%s3830_s3 + $0x1c0] sm:$0xff]   ;;  %v3007_v33 = vld [vmem:[%s3830_s3 + $0x238] sm:$0xff]  }
 0x197   : > { %v2841_v41 = vpack.i.bf16 %v1206_v37, %v1207_v38  ;;  %v2475_v42 = vpack.c.bf16 %v1206_v37, %v1207_v38  ;;  %v2490_v43 = vpack.c.bf16 %v1237_v40, %v1236_v39  ;;  %v2866_v44 = vpack.i.bf16 %v1237_v40, %v1236_v39  ;;  %v3006_v32 = vld [vmem:[%s3830_s3 + $0x180] sm:$0xff]   ;;  %v3008_v38 = vld [vmem:[%s3830_s3 + $0x230] sm:$0xff]   ;;  %v3013_v40 = vld [vmem:[%s3830_s3 + $0x208] sm:$0xff]  }
 0x198   : > { %vm2150_vm0 = vcmask 1041408   ;;  %vm2146_vm2 = vcmask 15360  }
 0x199   : > { %2842 = vrot.lane.b32.xlu0 %v2841_v41, %s3029_s16  ;;  %2476 = vmatprep.mubr.msk.bf16.mxu1 %vm3163_vm4, %v2475_v42  ;;  %v3014_v42 = vld [vmem:[%s3830_s3 + $0x200] sm:$0xff]  }
 0x19a   : > { %2857 = vrot.lane.b32.xlu1 %v2846_v31, %s3030_s18 }
 0x19d   : > { %2852 = vrot.lane.b32.xlu0 %v2841_v41, %s3030_s18 }
 0x19e   : > { %2867 = vrot.lane.b32.xlu1 %v2866_v44, %s3030_s18 }
 0x1a1   : > { %2862 = vrot.lane.b32.xlu0 %v2866_v44, %s3029_s16 }
 0x208   : > { %v2848_v45 = vpop.permute.xlu1 %2847 }
 0x209   : > { %v2850_v46 = vunpack.i.h.bf16 %v2848_v45  ;;  %v2849_v47 = vunpack.i.l.bf16 %v2848_v45 }
 0x20b   : > { %v2481_v48 = vpack.c.bf16 %v2850_v46, %v2849_v47  ;;  %v2843_v49 = vpop.permute.xlu0 %2842  ;;  %v2071_v46 = vld [vmem:[%s3832_s5 + $0x78] sm:$0xff]  ;;  %v2070_v47 = vld [vmem:[%s3832_s5 + $0x70] sm:$0xff] }
 0x20c   : > { %v2845_v50 = vunpack.i.h.bf16 %v2843_v49  ;;  %v2844_v52 = vunpack.i.l.bf16 %v2843_v49  ;;  %v2858_v7 = vpop.permute.xlu1 %2857  ;;  %v2067_v49 = vld [vmem:[%s3832_s5 + $0x58] sm:$0xff] }
 0x20d   : > { %v2860_v8 = vunpack.i.h.bf16 %v2858_v7  ;;  %v2859_v25 = vunpack.i.l.bf16 %v2858_v7  ;;  %2482 = vmatprep.mubr.msk.bf16.mxu0 %vm3290_vm11, %v2481_v48  ;;  %v2069_v48 = vld [vmem:[%s3832_s5 + $0x68] sm:$0xff]  ;;  %v2064_v7 = vld [vmem:[%s3832_s5 + $0x40] sm:$0xff] }
 0x20e   : > { %v2478_v56 = vpack.c.bf16 %v2845_v50, %v2844_v52  ;;  %v2066_v50 = vld [vmem:[%s3832_s5 + $0x50] sm:$0xff]  ;;  %v2065_v52 = vld [vmem:[%s3832_s5 + $0x48] sm:$0xff] }
 0x20f   : > { %v2487_v58 = vpack.c.bf16 %v2860_v8, %v2859_v25  ;;  %v2853_v60 = vpop.permute.xlu0 %2852  ;;  %v2063_v8 = vld [vmem:[%s3832_s5 + $0x38] sm:$0xff]  ;;  %v2062_v25 = vld [vmem:[%s3832_s5 + $0x30] sm:$0xff] }
 0x210   : > { %v2855_v61 = vunpack.i.h.bf16 %v2853_v60  ;;  %v2854_v62 = vunpack.i.l.bf16 %v2853_v60  ;;  %2479 = vmatmul.mubr.msk.bf16.vlgmr.msra.gmra.mxu1 %vm3211_vm7, %v2478_v56  ;;  %v2868_v41 = vpop.permute.xlu1 %2867  ;;  %v2060_v56 = vld [vmem:[%s3832_s5 + $0x20] sm:$0xff]  ;;  %v2057_v60 = vld [vmem:[%s3832_s5 + $0x8] sm:$0xff] }
 0x211   : > { %2647 = vmatpush3.bf16.msra.mxu1 %v2976_v55  ;;  %2488 = vmatprep.mubr.msk.bf16.mxu1 %vm3301_vm13, %v2487_v58  ;;  %v2869_v44 = vunpack.i.l.bf16 %v2868_v41  ;;  %v2061_v55 = vld [vmem:[%s3832_s5 + $0x28] sm:$0xff]  ;;  %v2058_v58 = vld [vmem:[%s3832_s5 + $0x10] sm:$0xff] }
 0x212   : > { %v2484_v0 = vpack.c.bf16 %v2855_v61, %v2854_v62  ;;  %2648 = vmatprep.subr.bf16.mxu1 %v2978_v57  ;;  %v2059_v57 = vld [vmem:[%s3832_s5 + $0x18] sm:$0xff]  ;;  %v2056_v61 = vld [vmem:[%s3832_s5] sm:$0xff] }
 0x213   : > { %v2863_v31 = vpop.permute.xlu0 %2862  ;;  %v2144_v62 = vld [vmem:[%s3834_s7] sm:$0x3] }
 0x214   : > { %2485 = vmatmul.mubr.msk.bf16.vlgmr.msra.gmra.mxu0 %vm3272_vm10, %v2484_v0  ;;  %v2865_v34 = vunpack.i.h.bf16 %v2863_v31  ;;  %v2864_v37 = vunpack.i.l.bf16 %v2863_v31 }
 0x215   : > { %2649 = vmatpush3.bf16.msra.mxu1 %v2979_v6  ;;  %2669 = vmatpush3.bf16.msra.mxu0 %v2980_v63 }
 0x216   : > { %2491 = vmatprep.mubr.msk.bf16.mxu0 %vm3317_vm14, %v2490_v43  ;;  %2650 = vmatprep.subr.bf16.mxu1 %v2981_v1  ;;  %v2493_v39 = vpack.c.bf16 %v2865_v34, %v2864_v37  ;;  %v2870_v43 = vunpack.i.h.bf16 %v2868_v41 }
 0x217   : > { %2670 = vmatprep.subr.bf16.mxu0 %v2982_v36 }
 0x218   : > { %v2496_v45 = vpack.c.bf16 %v2870_v43, %v2869_v44 }
 0x219   : > { %2651 = vmatpush3.bf16.msra.mxu1 %v2983_v13  ;;  %2671 = vmatpush3.bf16.msra.mxu0 %v2984_v4 }
 0x21a   : > { %2652 = vmatprep.subr.bf16.mxu1 %v2985_v59  ;;  %2672 = vmatprep.subr.bf16.mxu0 %v2986_v54 }
 0x21d   : > { %2653 = vmatpush3.bf16.msra.mxu1 %v2987_v5  ;;  %2673 = vmatpush3.bf16.msra.mxu0 %v2988_v19 }
 0x21e   : > { %2654 = vmatprep.subr.bf16.mxu1 %v2989_v22  ;;  %2674 = vmatprep.subr.bf16.mxu0 %v2990_v9 }
 0x221   : > { %2655 = vmatpush3.bf16.msra.mxu1 %v2991_v10  ;;  %2675 = vmatpush3.bf16.msra.mxu0 %v2992_v11 }
 0x222   : > { %2656 = vmatprep.subr.bf16.mxu1 %v2993_v12  ;;  %2676 = vmatprep.subr.bf16.mxu0 %v2994_v14  ;;  %v2401_v12 = vld [vmem:[%s3831_s4] ss:$0 sm:$0xff] }
 0x225   : > { %2657 = vmatpush3.bf16.msra.mxu1 %v2995_v15  ;;  %2677 = vmatpush3.bf16.msra.mxu0 %v2996_v16 }
 0x226   : > { %2658 = vmatprep.subr.bf16.mxu1 %v2997_v17  ;;  %2678 = vmatprep.subr.bf16.mxu0 %v2998_v18 }
 0x229   : > { %2659 = vmatpush3.bf16.msra.mxu1 %v2999_v20  ;;  %2679 = vmatpush3.bf16.msra.mxu0 %v3000_v23 }
 0x22a   : > { %2660 = vmatprep.subr.bf16.mxu1 %v3001_v24  ;;  %2680 = vmatprep.subr.bf16.mxu0 %v3002_v26 }
 0x22d   : > { %2661 = vmatpush3.bf16.msra.mxu1 %v3003_v27  ;;  %2681 = vmatpush3.bf16.msra.mxu0 %v3004_v29 }
 0x22e   : > { %2682 = vmatprep.subr.bf16.mxu0 %v3005_v30  ;;  %2738 = vmatprep.subr.bf16.mxu1 %v3032_v51 }
 0x230   : > { %1959 = vmatmul.mubr.bf16.vlgmr.msra.gmra.mxu1 %v1256_v35  ;;  %v3012_v35 = vld [vmem:[%s3830_s3 + $0x210] sm:$0xff]  }
 0x231   : > { %2683 = vmatpush3.bf16.msra.mxu0 %v3006_v32  ;;  %2739 = vmatpush3.bf16.msra.mxu1 %v3007_v33 }
 0x232   : > { %2740 = vmatprep.subr.bf16.mxu1 %v3032_v51  ;;  %2754 = vmatprep.mubr.msk.bf16.mxu1 %vm3033_vm1, %v3032_v51 }
 0x233   : > { %2758 = vmatprep.subr.mxu0 %v3032_v51 }
 0x234   : > { %2494 = vmatmul.mubr.msk.bf16.vlgmr.msra.gmra.mxu0 %vm3419_vm3, %v2493_v39 }
 0x235   : > { %2741 = vmatpush3.bf16.msra.mxu1 %v3008_v38  ;;  %2790 = vmatprep.mubr.msk.f32.mxu0 %vm3033_vm1, %v3032_v51 }
 0x236   : > { %2742 = vmatprep.subr.bf16.mxu1 %v3032_v51  ;;  %2759 = vmatpush3.msra.mxu0 %v2071_v46  ;;  %v2072_v46 = vld [vmem:[%s3833_s6] sm:$0x1] }
 0x237   : > { %2760 = vmatprep.subr.mxu0 %v3032_v51 }
 0x238   : > { %2761 = vmatpush3.msra.mxu0 %v2070_v47 }
 0x239   : > { %2743 = vmatpush3.bf16.msra.mxu1 %v3009_v21  ;;  %2762 = vmatprep.subr.mxu0 %v3032_v51 }
 0x23a   : > { %2744 = vmatprep.subr.bf16.mxu1 %v3032_v51  ;;  %2763 = vmatpush3.msra.mxu0 %v2069_v48 }
 0x23b   : > { %2764 = vmatprep.subr.mxu0 %v3032_v51 }
 0x23c   : > { %2765 = vmatpush3.msra.mxu0 %v2068_v3 }
 0x23d   : > { %2745 = vmatpush3.bf16.msra.mxu1 %v3010_v28  ;;  %2766 = vmatprep.subr.mxu0 %v3032_v51 }
 0x23e   : > { %2746 = vmatprep.subr.bf16.mxu1 %v3032_v51  ;;  %2767 = vmatpush3.msra.mxu0 %v2067_v49 }
 0x23f   : > { %2768 = vmatprep.subr.mxu0 %v3032_v51 }
 0x240   : > { %2769 = vmatpush3.msra.mxu0 %v2066_v50  ;;  %v2145_v50 = vld [vmem:[%s3835_s8] sm:$0x1] }
 0x241   : > { %2747 = vmatpush3.bf16.msra.mxu1 %v3011_v53  ;;  %2770 = vmatprep.subr.mxu0 %v3032_v51 }
 0x242   : > { %2748 = vmatprep.subr.bf16.mxu1 %v3032_v51  ;;  %2771 = vmatpush3.msra.mxu0 %v2065_v52 }
 0x243   : > { %2772 = vmatprep.subr.mxu0 %v3032_v51 }
 0x244   : > { %2773 = vmatpush3.msra.mxu0 %v2064_v7 }
 0x245   : > { %2749 = vmatpush3.bf16.msra.mxu1 %v3012_v35  ;;  %2774 = vmatprep.subr.mxu0 %v3032_v51 }
 0x246   : > { %2750 = vmatprep.subr.bf16.mxu1 %v3032_v51  ;;  %2775 = vmatpush3.msra.mxu0 %v2063_v8 }
 0x247   : > { %2776 = vmatprep.subr.mxu0 %v3032_v51 }
 0x248   : > { %2777 = vmatpush3.msra.mxu0 %v2062_v25 }
 0x249   : > { %2751 = vmatpush3.bf16.msra.mxu1 %v3013_v40  ;;  %2778 = vmatprep.subr.mxu0 %v3032_v51 }
 0x24a   : > { %2752 = vmatprep.subr.bf16.mxu1 %v3032_v51  ;;  %2779 = vmatpush3.msra.mxu0 %v2061_v55 }
 0x24b   : > { %2780 = vmatprep.subr.mxu0 %v3032_v51 }
 0x24c   : > { %2781 = vmatpush3.msra.mxu0 %v2060_v56 }
 0x24d   : > { %2753 = vmatpush3.bf16.msra.mxu1 %v3014_v42  ;;  %2782 = vmatprep.subr.mxu0 %v3032_v51 }
 0x24e   : > { %2793 = vmatprep.subr.mxu1 %v3032_v51  ;;  %2783 = vmatpush3.msra.mxu0 %v2059_v57  ;;  %v2232_v57 = vsub.s32 0, %v3097_v2 }
 0x24f   : > { %2784 = vmatprep.subr.mxu0 %v3032_v51 }
 0x250   : > { %2755 = vmatmul.mubr.msk.bf16.vlgmr.msra.gmra.mxu1 %vm3455_vm6, %v2496_v45  ;;  %2785 = vmatpush3.msra.mxu0 %v2058_v58 }
 0x251   : > { %2795 = vmatprep.mubr.msk.f32.mxu1 %vm3033_vm1, %v3032_v51  ;;  %2786 = vmatprep.subr.mxu0 %v3032_v51 }
 0x252   : > { %2787 = vmatpush3.msra.mxu0 %v2057_v60  ;;  %2794 = vmatpush3.msk.msra.mxu1 %vm2150_vm0, %v2144_v62 }
 0x253   : > { %2788 = vmatprep.subr.mxu0 %v3032_v51 }
 0x254   : > { %2789 = vmatpush3.msra.mxu0 %v2056_v61 }
 0x2d0   : > { %v2618_v6 = vpop.f32.mrf.mxu1 }
 0x2d2   : > { %v2619_v0 = vpop.f32.mrf.mxu1 }
 0x2d3   : > { %v2620_v10 = vadd.f32 %v2619_v0, %v2618_v6  ;;  %v3019_v6 = vld [vmem:[%s3114_s22] sm:$0xff]  ;;  %v3020_v0 = vld [vmem:[%s3114_s22 + $0x8] sm:$0xff] }
 0x2d4   : > { %v2640_v63 = vpop.f32.mrf.mxu0  ;;  %v2621_v36 = vpop.f32.mrf.mxu1 }
 0x2d5   : > { %v1879_v18 = vadd.f32 %v2620_v10, %v2401_v12 }
 0x2d6   : > { %v2641_v1 = vpop.f32.mrf.mxu0  ;;  %v2622_v4 = vpop.f32.mrf.mxu1 }
 0x2d7   : > { %v2623_v11 = vadd.f32 %v2622_v4, %v2621_v36  ;;  %v2642_v15 = vadd.f32 %v2641_v1, %v2640_v63 }
 0x2d8   : > { %v2643_v13 = vpop.f32.mrf.mxu0 }
 0x2d9   : > { %v1882_v20 = vadd.f32 %v2623_v11, %v2401_v12  ;;  %v1920_v26 = vadd.f32 %v2642_v15, %v1879_v18 }
 0x2da   : > { %v2644_v59 = vpop.f32.mrf.mxu0 }
 0x2db   : > { %v2645_v16 = vadd.f32 %v2644_v59, %v2643_v13 }
 0x2dd   : > { %v1923_v27 = vadd.f32 %v2645_v16, %v1882_v20 }
 0x2f0   : > { %v2662_v54 = vpop.f32.mrf.mxu1 }
 0x2f2   : > { %v2663_v19 = vpop.f32.mrf.mxu1 }
 0x2f3   : > { %v2664_v23 = vadd.f32 %v2663_v19, %v2662_v54 }
 0x2f4   : > { %v2684_v5 = vpop.f32.mrf.mxu0  ;;  %v2665_v51 = vpop.f32.mrf.mxu1 }
 0x2f5   : > { %v1961_v32 = vadd.f32 %v2664_v23, %v1920_v26 }
 0x2f6   : > { %v2685_v22 = vpop.f32.mrf.mxu0  ;;  %v2666_v14 = vpop.f32.mrf.mxu1 }
 0x2f7   : > { %v2667_v24 = vadd.f32 %v2666_v14, %v2665_v51  ;;  %v2686_v29 = vadd.f32 %v2685_v22, %v2684_v5 }
 0x2f8   : > { %v2687_v9 = vpop.f32.mrf.mxu0 }
 0x2f9   : > { %v1964_v33 = vadd.f32 %v2667_v24, %v1923_v27  ;;  %v2002_v37 = vadd.f32 %v2686_v29, %v1961_v32 }
 0x2fa   : > { %v2688_v17 = vpop.f32.mrf.mxu0 }
 0x2fb   : > { %v2689_v30 = vadd.f32 %v2688_v17, %v2687_v9 }
 0x2fd   : > { %v2005_v38 = vadd.f32 %v2689_v30, %v1964_v33 }
 0x310   : > { %v2042_v31 = vpop.f32.mrf.mxu1 }
 0x311   : > { %v2043_v21 = vadd.f32 %v2042_v31, %v2002_v37 }
 0x312   : > { %v2756_v34 = vpop.f32.mrf.mxu1 }
 0x314   : > { %v2045_v39 = vpop.f32.mrf.mxu1 }
 0x315   : > { %v2046_v28 = vadd.f32 %v2045_v39, %v2005_v38 }
 0x316   : > { %v2757_v53 = vpop.f32.mrf.mxu1 }
 0x317   : > { %v2049_v35 = vadd.f32 %v2046_v28, %v2043_v21 }
 0x319   : > { %v2050_v40 = vrot.slane %v2049_v35, 4 }
 0x31b   : > { %v2051_v41 = vadd.f32 %v2050_v40, %v2049_v35 }
 0x31d   : > { %v2052_v42 = vrot.slane %v2051_v41, 2 }
 0x31f   : > { %v2053_v43 = vadd.f32 %v2052_v42, %v2051_v41 }
 0x321   : > { %v2054_v44 = vrot.slane %v2053_v43, 1 }
 0x323   : > { %v2055_v45 = vadd.f32 %v2054_v44, %v2053_v43 }
 0x325   : > { %2791 = vmatmul.mubr.f32.vlgmr.msra.gmra.mxu0 %v2055_v45 }
 0x3e5   : > { %v2139_v47 = vpop.f32.mrf.mxu0 }
 0x3e6   : > { %v2140_v48 = vadd.f32 %v2139_v47, %v2072_v46 }
 0x3e7   : > { %v2792_v3 = vpop.f32.mrf.mxu0 }
 0x3e8   : > { %v2143_v49 = vmax.f32 %v2140_v48, 0.0 }
 0x3ea   : > { %2796 = vmatmul.mubr.msk.f32.vlgmr.msra.gmra.mxu1 %vm2146_vm2, %v2143_v49 }
 0x4aa   : > { %v2220_v52 = vpop.f32.mrf.mxu1 }
 0x4ab   : > { %v2221_v7 = vadd.f32 %v2220_v52, %v2145_v50 }
 0x4ac   : > { %v2797_v8 = vpop.f32.mrf.mxu1 }
 0x4ad   : > { %v2500_v25 = vmul.f32 -1.442695, %v2221_v7 }
 0x4af   : > { %3015 = vpow2.f32 %v2500_v25 }
 0x4bc   : > { %v3016_v55 = vpop.eup %3015 }
 0x4bd   : > { %v2227_v56 = vadd.f32 1.0, %v3016_v55 }
 0x4bf   : > { %3017 = vrcp.f32 %v2227_v56 }
 0x4cc   : > { %v3018_v58 = vpop.eup %3017 }
 0x4cd   : > { %v2233_v60 = vrot.slane %v3018_v58, %v2232_v57 }
 0x4cf   : > { %v2234_v61 = vmul.f32 %v2233_v60, %v2043_v21  ;;  %v2235_v62 = vmul.f32 %v2233_v60, %v2046_v28 }
 0x4d1   : > { %v2236_v63 = vadd.f32 %v3019_v6, %v2234_v61  ;;  %v2237_v1 = vadd.f32 %v3020_v0, %v2235_v62 }
 0x4d3   : > { %2238 = vst [vmem:[%s332_s14] sm:$0xff] %v2236_v63  ;;  %2239 = vst [vmem:[%s332_s14 + $0x8] sm:$0xff] %v2237_v1 }
 0x4d4 PF: > { %s19_s30 = sadd.s32 1, %s3027_s30  }
 0x4d5   : > { %p16_p4 = scmp.ge.s32.totalorder %s19_s30, 4  }
 0x4d7   :  { %18 = sbr.rel (!%p16_p4) target bundleno = 1 (0x1), region = 86 }

</bundles_post_ra>
